<compile_context>
chip_gen: v7x
topology: tpu7x:2x2x1
jax: 0.10.0
libtpu: 0.0.40
codegen_flags: <defaults>
</compile_context>

<pallas_src>
import jax
import jax.numpy as jnp
from jax.experimental import pallas as pl
from jax.experimental.pallas import tpu as pltpu

INPUT_DIM = 17
H1 = 512
H2 = 1024
OUTPUT_DIM = 4
BATCH = 8            # small batch for the example run

K_PAD = 128          # padded input-feature dim (zero padding, result unchanged)
OUT_PAD = 128        # padded output dim (lane-dense stores; sliced in wrapper)


def _round_up(x, m):
    return (x + m - 1) // m * m


def vip_mlp_kernel(x_ref, w1_ref, b1_ref, w2_ref, b2_ref, w3_ref, b3_ref, o_ref):
    """Fused 3-layer MLP on one batch tile: relu(relu(xW1+b1)W2+b2)W3+b3."""
    x = x_ref[...]                                       # [TB, K_PAD] bf16

    # Layer 1: Linear(K_PAD -> 512) + ReLU   (f32 accumulation on the MXU).
    h1 = jnp.dot(x, w1_ref[...], preferred_element_type=jnp.float32)
    # Cast to bf16 right after bias+ReLU: halves live intermediate footprint.
    h1 = jnp.maximum(h1 + b1_ref[...], 0.0).astype(jnp.bfloat16)

    # Layer 2: Linear(512 -> 1024) + ReLU
    h2 = jnp.dot(h1, w2_ref[...], preferred_element_type=jnp.float32)
    h2 = jnp.maximum(h2 + b2_ref[...], 0.0).astype(jnp.bfloat16)

    # Layer 3: Linear(1024 -> OUT_PAD), no activation. bf16 store (padded slab).
    out = jnp.dot(h2, w3_ref[...], preferred_element_type=jnp.float32)
    o_ref[...] = (out + b3_ref[...]).astype(o_ref.dtype)


def pack_params(p):
    """Pad + cast f32 (PyTorch-layout) params into the kernel layout.

    w1: [17,512]   -> [K_PAD,512]  bf16 (rows >= 17 zero)
    w2: [512,1024] -> bf16
    w3: [1024,4]   -> [1024,OUT_PAD] bf16 (cols >= 4 zero)
    biases stay f32 (tiny; preserves accuracy), b3 padded to [1,OUT_PAD].
    """
    w1 = jnp.zeros((K_PAD, H1), jnp.float32).at[:INPUT_DIM, :].set(p["w1"])
    w3 = jnp.zeros((H2, OUT_PAD), jnp.float32).at[:, :OUTPUT_DIM].set(p["w3"])
    b3 = jnp.zeros((1, OUT_PAD), jnp.float32).at[:, :OUTPUT_DIM].set(p["b3"])
    return {
        "w1": w1.astype(jnp.bfloat16),
        "b1": p["b1"].astype(jnp.float32),
        "w2": p["w2"].astype(jnp.bfloat16),
        "b2": p["b2"].astype(jnp.float32),
        "w3": w3.astype(jnp.bfloat16),
        "b3": b3,
    }


def vip_forward(obs, packed, *, tb=256):
    """Run the fused MLP Pallas kernel.

    obs:    [B, INPUT_DIM] float32
    packed: output of pack_params (bf16 weights, padded shapes)
    tb:     batch tile (rows per grid step). 256 suits v6e/v7x; use 128 on v5e.
    """
    B = obs.shape[0]
    # bf16 native sublane tile is 16 rows -> keep tiles multiples of 16.
    TB = _round_up(min(tb, _round_up(B, 16)), 16)
    B_pad = _round_up(B, TB)
    num_tiles = B_pad // TB

    # Zero-pad batch/feature axes and cast activations to bf16. Done here so
    # the caller's jit fuses it with the pallas_call dispatch (no separate op).
    x = jnp.zeros((B_pad, K_PAD), jnp.bfloat16)
    x = x.at[:B, :INPUT_DIM].set(obs.astype(jnp.bfloat16))

    w1, b1 = packed["w1"], packed["b1"]
    w2, b2 = packed["w2"], packed["b2"]
    w3, b3 = packed["w3"], packed["b3"]

    # Weights/biases: constant block index -> DMA'd once, VMEM-resident
    # across all batch tiles.
    const = lambda a: pl.BlockSpec(a.shape, lambda i: (0,) * a.ndim)

    # Shard batch tiles across TensorCores only when each TC gets enough
    # compute to amortize its own ~1.4 MiB weight copy (weight-DMA-bound
    # otherwise, e.g. the tiny-batch policy-step regime).
    parallel = num_tiles >= 2 and B_pad >= 2048
    dim_sem = ("parallel",) if parallel else ("arbitrary",)

    flops = 2 * B_pad * (K_PAD * H1 + H1 * H2 + H2 * OUT_PAD)
    bytes_accessed = (
        x.size * 2                                     # obs (bf16)
        + (w1.size + w2.size + w3.size) * 2            # weights (bf16)
        + (b1.size + b2.size + b3.size) * 4            # biases (f32)
        + B_pad * OUT_PAD * 2                          # output (bf16)
    )

    out = pl.pallas_call(
        vip_mlp_kernel,
        out_shape=jax.ShapeDtypeStruct((B_pad, OUT_PAD), jnp.bfloat16),
        grid=(num_tiles,),
        in_specs=[
            pl.BlockSpec((TB, K_PAD), lambda i: (i, 0)),   # x tile per step
            const(w1), const(b1),
            const(w2), const(b2),
            const(w3), const(b3),
        ],
        out_specs=pl.BlockSpec((TB, OUT_PAD), lambda i: (i, 0)),
        compiler_params=pltpu.CompilerParams(
            dimension_semantics=dim_sem,
            vmem_limit_bytes=16 << 20,       # ~5 MiB footprint at TB=256
        ),
        cost_estimate=pl.CostEstimate(
            flops=flops, transcendentals=0, bytes_accessed=bytes_accessed),
    )(x, w1, b1, w2, b2, w3, b3)

    # Slice the real [B, 4] block out of the padded bf16 slab; tiny f32 cast
    # keeps the public dtype identical to the PyTorch module.
    return out[:B, :OUTPUT_DIM].astype(jnp.float32)


def init_params(key):
    """Deterministic f32 parameter init (Kaiming-ish uniform like torch.nn.Linear)."""
    ks = jax.random.split(key, 6)

    def linear_init(kw, kb, fan_in, fan_out):
        bound = 1.0 / jnp.sqrt(jnp.float32(fan_in))
        w = jax.random.uniform(kw, (fan_in, fan_out), jnp.float32, -bound, bound)
        b = jax.random.uniform(kb, (1, fan_out), jnp.float32, -bound, bound)
        return w, b

    w1, b1 = linear_init(ks[0], ks[1], INPUT_DIM, H1)
    w2, b2 = linear_init(ks[2], ks[3], H1, H2)
    w3, b3 = linear_init(ks[4], ks[5], H2, OUTPUT_DIM)
    return {"w1": w1, "b1": b1, "w2": w2, "b2": b2, "w3": w3, "b3": b3}


def reference_forward(obs, p):
    """Full-f32 reference (matches the PyTorch module semantics)."""
    h1 = jnp.maximum(obs @ p["w1"] + p["b1"], 0.0)
    h2 = jnp.maximum(h1 @ p["w2"] + p["b2"], 0.0)
    return h2 @ p["w3"] + p["b3"]


if __name__ == "__main__":
    key = jax.random.PRNGKey(0)
    k_obs, k_params = jax.random.split(key)

    obs = jax.random.normal(k_obs, (BATCH, INPUT_DIM), dtype=jnp.float32)
    params = init_params(k_params)
    packed = pack_params(params)

    # jit the whole forward so pad/cast/slice fuse into one XLA program around
    # the pallas_call (no standalone pad dispatch per call).
    fwd = jax.jit(vip_forward)
    out = jax.block_until_ready(fwd(obs, packed))

    ref = reference_forward(obs, params)
    assert out.shape == (BATCH, OUTPUT_DIM)
    # bf16 weights / activations / output -> relaxed tolerance vs f32 reference.
    assert jnp.allclose(out, ref, atol=5e-2, rtol=5e-2), "mismatch vs reference"

    print("KERNEL_OK")
</pallas_src>

<mosaic_0001>
module attributes {stable_mosaic.version = 11 : i64} {
  func.func @vip_mlp_kernel(%arg0: i32, %arg1: memref<16x128xbf16, #tpu.memory_space<vmem>>, %arg2: memref<128x512xbf16, #tpu.memory_space<vmem>>, %arg3: memref<1x512xf32, #tpu.memory_space<vmem>>, %arg4: memref<512x1024xbf16, #tpu.memory_space<vmem>>, %arg5: memref<1x1024xf32, #tpu.memory_space<vmem>>, %arg6: memref<1024x128xbf16, #tpu.memory_space<vmem>>, %arg7: memref<1x128xf32, #tpu.memory_space<vmem>>, %arg8: memref<16x128xbf16, #tpu.memory_space<vmem>>) attributes {dimension_semantics = [#tpu.dimension_semantics<arbitrary>], iteration_bounds = array<i64: 1>, scalar_prefetch = 0 : i64, scratch_operands = 0 : i64, tpu.core_type = #tpu.core_type<tc>, window_params = [{transform_indices = @transform_0, window_bounds = array<i64: 16, 128>}, {pipeline_mode = #tpu.pipeline_mode<synchronous>, transform_indices = @transform_1, window_bounds = array<i64: 128, 512>}, {pipeline_mode = #tpu.pipeline_mode<synchronous>, transform_indices = @transform_2, window_bounds = array<i64: 1, 512>}, {pipeline_mode = #tpu.pipeline_mode<synchronous>, transform_indices = @transform_3, window_bounds = array<i64: 512, 1024>}, {pipeline_mode = #tpu.pipeline_mode<synchronous>, transform_indices = @transform_4, window_bounds = array<i64: 1, 1024>}, {pipeline_mode = #tpu.pipeline_mode<synchronous>, transform_indices = @transform_5, window_bounds = array<i64: 1024, 128>}, {pipeline_mode = #tpu.pipeline_mode<synchronous>, transform_indices = @transform_6, window_bounds = array<i64: 1, 128>}, {transform_indices = @transform_7, window_bounds = array<i64: 16, 128>}]} {
    %c0 = arith.constant 0 : index
    %c0_0 = arith.constant 0 : index
    %0 = vector.load %arg1[%c0, %c0_0] : memref<16x128xbf16, #tpu.memory_space<vmem>>, vector<16x128xbf16>
    %c0_1 = arith.constant 0 : index
    %c0_2 = arith.constant 0 : index
    %1 = vector.load %arg2[%c0_1, %c0_2] : memref<128x512xbf16, #tpu.memory_space<vmem>>, vector<128x512xbf16>
    %cst = arith.constant dense<0.000000e+00> : vector<16x512xf32>
    %2 = tpu.matmul %0, %1, %cst {dimension_numbers = #tpu.dot_dimension_numbers<[1], [0], [0], [1], [0, 0, 1, 1], [], []>} : vector<16x128xbf16>, vector<128x512xbf16>, vector<16x512xf32> -> vector<16x512xf32>
    %c0_3 = arith.constant 0 : index
    %c0_4 = arith.constant 0 : index
    %3 = vector.load %arg3[%c0_3, %c0_4] : memref<1x512xf32, #tpu.memory_space<vmem>>, vector<1x512xf32>
    %4 = vector.broadcast %3 : vector<1x512xf32> to vector<16x512xf32>
    %5 = arith.addf %2, %4 : vector<16x512xf32>
    %cst_5 = arith.constant 0.000000e+00 : f32
    %6 = vector.broadcast %cst_5 : f32 to vector<16x512xf32>
    %7 = arith.maximumf %5, %6 : vector<16x512xf32>
    %8 = arith.truncf %7 : vector<16x512xf32> to vector<16x512xbf16>
    %c0_6 = arith.constant 0 : index
    %c0_7 = arith.constant 0 : index
    %9 = vector.load %arg4[%c0_6, %c0_7] : memref<512x1024xbf16, #tpu.memory_space<vmem>>, vector<512x1024xbf16>
    %cst_8 = arith.constant dense<0.000000e+00> : vector<16x1024xf32>
    %10 = tpu.matmul %8, %9, %cst_8 {dimension_numbers = #tpu.dot_dimension_numbers<[1], [0], [0], [1], [0, 0, 1, 1], [], []>} : vector<16x512xbf16>, vector<512x1024xbf16>, vector<16x1024xf32> -> vector<16x1024xf32>
    %c0_9 = arith.constant 0 : index
    %c0_10 = arith.constant 0 : index
    %11 = vector.load %arg5[%c0_9, %c0_10] : memref<1x1024xf32, #tpu.memory_space<vmem>>, vector<1x1024xf32>
    %12 = vector.broadcast %11 : vector<1x1024xf32> to vector<16x1024xf32>
    %13 = arith.addf %10, %12 : vector<16x1024xf32>
    %cst_11 = arith.constant 0.000000e+00 : f32
    %14 = vector.broadcast %cst_11 : f32 to vector<16x1024xf32>
    %15 = arith.maximumf %13, %14 : vector<16x1024xf32>
    %16 = arith.truncf %15 : vector<16x1024xf32> to vector<16x1024xbf16>
    %c0_12 = arith.constant 0 : index
    %c0_13 = arith.constant 0 : index
    %17 = vector.load %arg6[%c0_12, %c0_13] : memref<1024x128xbf16, #tpu.memory_space<vmem>>, vector<1024x128xbf16>
    %cst_14 = arith.constant dense<0.000000e+00> : vector<16x128xf32>
    %18 = tpu.matmul %16, %17, %cst_14 {dimension_numbers = #tpu.dot_dimension_numbers<[1], [0], [0], [1], [0, 0, 1, 1], [], []>} : vector<16x1024xbf16>, vector<1024x128xbf16>, vector<16x128xf32> -> vector<16x128xf32>
    %c0_15 = arith.constant 0 : index
    %c0_16 = arith.constant 0 : index
    %19 = vector.load %arg7[%c0_15, %c0_16] : memref<1x128xf32, #tpu.memory_space<vmem>>, vector<1x128xf32>
    %20 = vector.broadcast %19 : vector<1x128xf32> to vector<16x128xf32>
    %21 = arith.addf %18, %20 : vector<16x128xf32>
    %22 = arith.truncf %21 : vector<16x128xf32> to vector<16x128xbf16>
    %c0_17 = arith.constant 0 : index
    %c0_18 = arith.constant 0 : index
    %23 = vector.load %arg8[%c0_17, %c0_18] : memref<16x128xbf16, #tpu.memory_space<vmem>>, vector<16x128xbf16>
    tpu.vector_store %arg8[%c0_17, %c0_18], %22 {strides = array<i32>} : memref<16x128xbf16, #tpu.memory_space<vmem>>, vector<16x128xbf16>,
    return
  }
  func.func @transform_0(%arg0: i32) -> (i32, i32) {
    %c0_i32 = arith.constant 0 : i32
    %c0_i32_0 = arith.constant 0 : i32
    return %arg0, %c0_i32 : i32, i32
  }
  func.func @transform_1(%arg0: i32) -> (i32, i32) {
    %c0_i32 = arith.constant 0 : i32
    %c0_i32_0 = arith.constant 0 : i32
    %c0_i32_1 = arith.constant 0 : i32
    return %c0_i32, %c0_i32_0 : i32, i32
  }
  func.func @transform_2(%arg0: i32) -> (i32, i32) {
    %c0_i32 = arith.constant 0 : i32
    %c0_i32_0 = arith.constant 0 : i32
    %c0_i32_1 = arith.constant 0 : i32
    return %c0_i32, %c0_i32_0 : i32, i32
  }
  func.func @transform_3(%arg0: i32) -> (i32, i32) {
    %c0_i32 = arith.constant 0 : i32
    %c0_i32_0 = arith.constant 0 : i32
    %c0_i32_1 = arith.constant 0 : i32
    return %c0_i32, %c0_i32_0 : i32, i32
  }
  func.func @transform_4(%arg0: i32) -> (i32, i32) {
    %c0_i32 = arith.constant 0 : i32
    %c0_i32_0 = arith.constant 0 : i32
    %c0_i32_1 = arith.constant 0 : i32
    return %c0_i32, %c0_i32_0 : i32, i32
  }
  func.func @transform_5(%arg0: i32) -> (i32, i32) {
    %c0_i32 = arith.constant 0 : i32
    %c0_i32_0 = arith.constant 0 : i32
    %c0_i32_1 = arith.constant 0 : i32
    return %c0_i32, %c0_i32_0 : i32, i32
  }
  func.func @transform_6(%arg0: i32) -> (i32, i32) {
    %c0_i32 = arith.constant 0 : i32
    %c0_i32_0 = arith.constant 0 : i32
    %c0_i32_1 = arith.constant 0 : i32
    return %c0_i32, %c0_i32_0 : i32, i32
  }
  func.func @transform_7(%arg0: i32) -> (i32, i32) {
    %c0_i32 = arith.constant 0 : i32
    %c0_i32_0 = arith.constant 0 : i32
    return %arg0, %c0_i32 : i32, i32
  }
}

</mosaic_0001>

<bundles_post_ra>
// kernel: vip_forward.1
= control target key start
LH: loop header
LB: loop body
LE: loop exit
PB: predicated region body
PF: predicated region fallthrough
CT: control target
= control target key end

     0   :  { %12 = vsyncpa [#allocation3], 0  ;;  %s3870_s0 = inlined_call_operand.vmem [shape: bf16[16,128], index: 0, kind: input, shape index: {}]   ;;  %s3871_s1 = inlined_call_operand.hbm [shape: bf16[128,512], index: 1, kind: input, shape index: {}]   ;;  %s3872_s2 = inlined_call_operand.vmem [shape: f32[1,512], index: 2, kind: input, shape index: {}]   ;;  %s3873_s3 = inlined_call_operand.hbm [shape: bf16[512,1024], index: 3, kind: input, shape index: {}]   ;;  %s3874_s4 = inlined_call_operand.vmem [shape: f32[1,1024], index: 4, kind: input, shape index: {}]   ;;  %s3875_s5 = inlined_call_operand.hbm [shape: bf16[1024,128], index: 5, kind: input, shape index: {}]   ;;  %s3876_s6 = inlined_call_operand.vmem [shape: f32[1,128], index: 6, kind: input, shape index: {}]   ;;  %s3877_s7 = inlined_call_operand.vmem [shape: bf16[16,128], index: 7, kind: output, shape index: {}]  }
   0x1   :  { %13 = vsyncpa [#allocation5], 0  ;;  %s3709_s24 = smov [#allocation4]   ;;  %s3639_s28 = scalar_lea.hbm %s3873_s3, 32768 }
   0x2   :  { %s35_s25 = sshll.u32 %s3709_s24, 4  ;;  %p3640_p0 = scmp.ne.s32.totalorder %s3873_s3, %s3639_s28  ;;  %s36_s25 = int_to_ptr.vmem [resolvable:$true] %s35_s25 }
   0x3   :  { %p3643_p1 = scmp.lt.u32.totalorder %s3639_s28, %s3873_s3 }
   0x5   :  { %p3645_p2 = pnand %p3643_p1, %p3640_p0 }
   0x7   :  { %3648 = shalt.err (!%p3645_p2)
}
   0x8   :  { %s3649_s10 = scalar_lea.vmem %s36_s25, 32768  ;;  %p3654_p4 = scmp.lt.s32.totalorder %s36_s25, %s36_s25 }
   0x9   :  { %p3650_p3 = scmp.ne.s32.totalorder %s36_s25, %s3649_s10  ;;  %p3655_p5 = scmp.lt.s32.totalorder %s3649_s10, %s3649_s10 }
   0xb   :  { %p3656_p6 = por %p3655_p5, %p3654_p4 }
   0xd   :  { %p3657_p7 = pnand %p3656_p6, %p3650_p3 }
   0xf   :  { %3660 = shalt.err (!%p3657_p7)
}
  0x10   :  { %s3710_s11 = smov 512   ;;  %s3711_s12 = smov 32  }
  0x11   :  { %41 = dma.hbm_to_vmem [thread:$0]  %s3873_s3, 32768, %s36_s25, [#allocation5], %s3710_s11, %s3710_s11, %s3711_s12  }
  0x12   :  { %s3712_s15 = smov [#allocation2]   ;;  %s3661_s19 = scalar_lea.hbm %s3871_s1, 4096 }
  0x13   :  { %s21_s16 = sshll.u32 %s3712_s15, 4  ;;  %p3662_p8 = scmp.ne.s32.totalorder %s3871_s1, %s3661_s19  ;;  %s22_s16 = int_to_ptr.vmem [resolvable:$true] %s21_s16 }
  0x14   :  { %p3665_p9 = scmp.lt.u32.totalorder %s3661_s19, %s3871_s1 }
  0x16   :  { %p3667_p10 = pnand %p3665_p9, %p3662_p8 }
  0x18   :  { %3670 = shalt.err (!%p3667_p10)
}
  0x19   :  { %s3671_s24 = scalar_lea.vmem %s22_s16, 4096  ;;  %p3676_p12 = scmp.lt.s32.totalorder %s22_s16, %s22_s16 }
  0x1a   :  { %p3672_p11 = scmp.ne.s32.totalorder %s22_s16, %s3671_s24  ;;  %p3677_p13 = scmp.lt.s32.totalorder %s3671_s24, %s3671_s24 }
  0x1c   :  { %p3678_p0 = por %p3677_p13, %p3676_p12 }
  0x1e   :  { %p3679_p1 = pnand %p3678_p0, %p3672_p11 }
  0x20   :  { %3682 = shalt.err (!%p3679_p1)
}
  0x21   :  { %s3713_s3 = smov 256   ;;  %s3714_s25 = smov 16  }
  0x22   :  { %27 = dma.hbm_to_vmem [thread:$0]  %s3871_s1, 4096, %s22_s16, [#allocation3], %s3713_s3, %s3713_s3, %s3714_s25  }
  0x23   :  { %s3715_s28 = smov [#allocation6]   ;;  %s3683_s9 = scalar_lea.hbm %s3875_s5, 8192 }
  0x24   :  { %s49_s29 = sshll.u32 %s3715_s28, 4  ;;  %p3684_p2 = scmp.ne.s32.totalorder %s3875_s5, %s3683_s9  ;;  %s50_s29 = int_to_ptr.vmem [resolvable:$true] %s49_s29 }
  0x25   :  { %p3687_p3 = scmp.lt.u32.totalorder %s3683_s9, %s3875_s5 }
  0x27   :  { %p3689_p4 = pnand %p3687_p3, %p3684_p2 }
  0x29   :  { %3692 = shalt.err (!%p3689_p4)
}
  0x2a   :  { %s3693_s14 = scalar_lea.vmem %s50_s29, 8192  ;;  %p3698_p6 = scmp.lt.s32.totalorder %s50_s29, %s50_s29 }
  0x2b   :  { %p3694_p5 = scmp.ne.s32.totalorder %s50_s29, %s3693_s14  ;;  %p3699_p7 = scmp.lt.s32.totalorder %s3693_s14, %s3693_s14 }
  0x2d   :  { %p3700_p8 = por %p3699_p7, %p3698_p6 }
  0x2f   :  { %p3701_p9 = pnand %p3700_p8, %p3694_p5 }
  0x31   :  { %3704 = shalt.err (!%p3701_p9)
}
  0x32   :  { %s3716_s1 = smov 64   ;;  %s3717_s15 = smov 4  }
  0x33   :  { %55 = dma.hbm_to_vmem [thread:$0]  %s3875_s5, 8192, %s50_s29, [#allocation5], %s3716_s1, %s3716_s1, %s3717_s15  }
  0x34   :  { %3705 = dma.done.wait [#allocation3], 4096  }
  0x35   :  { %3706 = vsyncadd [#allocation3], 4294963200 }
  0x36   :  { %3707 = dma.done.wait [#allocation5], 40960  }
  0x37   :  { %3708 = vsyncadd [#allocation5], 4294926336  ;;  %v3718_v0 = vmov 0   ;;  %v3526_v1 = vld [vmem:[#allocation2 + $0x4] ss:$16 sps:$4 sm:$0xff]   ;;  %v389_v43 = vld [vmem:[#allocation4 + $0x8] sm:$0xff] }
  0x38   :  { %322 = vmatprep.mubr.bf16.mxu0 %v3718_v0  ;;  %365 = vmatprep.mubr.bf16.mxu1 %v3718_v0  ;;  %v3528_v2 = vld [vmem:[#allocation2] ss:$16 sps:$4 sm:$0xff]   ;;  %v3529_v3 = vld [vmem:[#allocation2 + $0x24] ss:$16 sps:$4 sm:$0xff]   ;;  %v3551_v10 = vld [vmem:[#allocation2 + $0xc] ss:$16 sps:$4 sm:$0xff]  }
  0x39   :  { %290 = vmatprep.subr.bf16.mxu0 %v3526_v1  ;;  %v3531_v4 = vld [vmem:[#allocation2 + $0x20] ss:$16 sps:$4 sm:$0xff]   ;;  %v3532_v5 = vld [vmem:[#allocation2 + $0x44] ss:$16 sps:$4 sm:$0xff]   ;;  %v3553_v11 = vld [vmem:[#allocation2 + $0x8] ss:$16 sps:$4 sm:$0xff]   ;;  %333 = vmatprep.subr.bf16.mxu1 %v3551_v10 }
  0x3a   :  { %291 = vmatpush1.bf16.msra.mxu0 %v3528_v2  ;;  %v3534_v6 = vld [vmem:[#allocation2 + $0x40] ss:$16 sps:$4 sm:$0xff]   ;;  %v3535_v7 = vld [vmem:[#allocation2 + $0x64] ss:$16 sps:$4 sm:$0xff]   ;;  %v3554_v12 = vld [vmem:[#allocation2 + $0x2c] ss:$16 sps:$4 sm:$0xff]   ;;  %334 = vmatpush1.bf16.msra.mxu1 %v3553_v11 }
  0x3b   :  { %292 = vmatprep.subr.bf16.mxu0 %v3529_v3  ;;  %v3537_v8 = vld [vmem:[#allocation2 + $0x60] ss:$16 sps:$4 sm:$0xff]   ;;  %v3538_v9 = vld [vmem:[#allocation2 + $0x84] ss:$16 sps:$4 sm:$0xff]   ;;  %v3556_v14 = vld [vmem:[#allocation2 + $0x28] ss:$16 sps:$4 sm:$0xff]   ;;  %335 = vmatprep.subr.bf16.mxu1 %v3554_v12 }
  0x3c   :  { %v3540_v13 = vld [vmem:[#allocation2 + $0x80] ss:$16 sps:$4 sm:$0xff]   ;;  %v3541_v15 = vld [vmem:[#allocation2 + $0xa4] ss:$16 sps:$4 sm:$0xff]   ;;  %v3557_v16 = vld [vmem:[#allocation2 + $0x4c] ss:$16 sps:$4 sm:$0xff]  }
  0x3d   :  { %v3543_v17 = vld [vmem:[#allocation2 + $0xa0] ss:$16 sps:$4 sm:$0xff]   ;;  %v3559_v18 = vld [vmem:[#allocation2 + $0x48] ss:$16 sps:$4 sm:$0xff]   ;;  %v3544_v19 = vld [vmem:[#allocation2 + $0xc4] ss:$16 sps:$4 sm:$0xff]  }
  0x3e   :  { %293 = vmatpush1.bf16.msra.mxu0 %v3531_v4  ;;  %336 = vmatpush1.bf16.msra.mxu1 %v3556_v14  ;;  %v3560_v20 = vld [vmem:[#allocation2 + $0x6c] ss:$16 sps:$4 sm:$0xff]   ;;  %v3546_v21 = vld [vmem:[#allocation2 + $0xc0] ss:$16 sps:$4 sm:$0xff]   ;;  %v3562_v22 = vld [vmem:[#allocation2 + $0x68] ss:$16 sps:$4 sm:$0xff]  }
  0x3f   :  { %294 = vmatprep.subr.bf16.mxu0 %v3532_v5  ;;  %337 = vmatprep.subr.bf16.mxu1 %v3557_v16  ;;  %v3547_v23 = vld [vmem:[#allocation2 + $0xe4] ss:$16 sps:$4 sm:$0xff]   ;;  %v3563_v24 = vld [vmem:[#allocation2 + $0x8c] ss:$16 sps:$4 sm:$0xff]   ;;  %v3549_v27 = vld [vmem:[#allocation2 + $0xe0] ss:$16 sps:$4 sm:$0xff]  }
  0x40   :  { %v388_v25 = vld [vmem:[#allocation4] sm:$0xff]  ;;  %v3565_v28 = vld [vmem:[#allocation2 + $0x88] ss:$16 sps:$4 sm:$0xff]   ;;  %v3566_v29 = vld [vmem:[#allocation2 + $0xac] ss:$16 sps:$4 sm:$0xff]  }
  0x41   :  { %v392_v26 = vld [vmem:[#allocation4 + $0x20] sm:$0xff]  ;;  %v3568_v34 = vld [vmem:[#allocation2 + $0xa8] ss:$16 sps:$4 sm:$0xff]   ;;  %v3569_v36 = vld [vmem:[#allocation2 + $0xcc] ss:$16 sps:$4 sm:$0xff]  }
  0x42   :  { %295 = vmatpush1.bf16.msra.mxu0 %v3534_v6  ;;  %338 = vmatpush1.bf16.msra.mxu1 %v3559_v18  ;;  %v3067_v30 = vcombine.high %v388_v25, %v392_v26  ;;  %v396_v31 = vld [vmem:[#allocation4 + $0x40] sm:$0xff]  ;;  %v3066_v35 = vcombine.low %v388_v25, %v392_v26  ;;  %v3571_v40 = vld [vmem:[#allocation2 + $0xc8] ss:$16 sps:$4 sm:$0xff]   ;;  %v3572_v42 = vld [vmem:[#allocation2 + $0xec] ss:$16 sps:$4 sm:$0xff]  }
  0x43   :  { %296 = vmatprep.subr.bf16.mxu0 %v3535_v7  ;;  %339 = vmatprep.subr.bf16.mxu1 %v3560_v20  ;;  %v400_v32 = vld [vmem:[#allocation4 + $0x60] sm:$0xff]  ;;  %v393_v45 = vld [vmem:[#allocation4 + $0x28] sm:$0xff] }
  0x44   :  { %v3550_v33 = vld [vmem:[%s3870_s0] sm:$0xff]   ;;  %v3075_v37 = vcombine.high %v396_v31, %v400_v32  ;;  %v3074_v41 = vcombine.low %v396_v31, %v400_v32  ;;  %v3574_v48 = vld [vmem:[#allocation2 + $0xe8] ss:$16 sps:$4 sm:$0xff]   ;;  %v3069_v50 = vcombine.high %v389_v43, %v393_v45  ;;  %v3068_v56 = vcombine.low %v389_v43, %v393_v45 }
  0x45   :  { %v404_v38 = vld [vmem:[#allocation4 + $0x80] sm:$0xff]  ;;  %v397_v51 = vld [vmem:[#allocation4 + $0x48] sm:$0xff] }
  0x46   :  { %297 = vmatpush1.bf16.msra.mxu0 %v3537_v8  ;;  %340 = vmatpush1.bf16.msra.mxu1 %v3562_v22  ;;  %v408_v39 = vld [vmem:[#allocation4 + $0xa0] sm:$0xff]  ;;  %v401_v52 = vld [vmem:[#allocation4 + $0x68] sm:$0xff] }
  0x47   :  { %298 = vmatprep.subr.bf16.mxu0 %v3538_v9  ;;  %341 = vmatprep.subr.bf16.mxu1 %v3563_v24  ;;  %v3083_v44 = vcombine.high %v404_v38, %v408_v39  ;;  %v412_v46 = vld [vmem:[#allocation4 + $0xc0] sm:$0xff]  ;;  %v3082_v49 = vcombine.low %v404_v38, %v408_v39  ;;  %v405_v57 = vld [vmem:[#allocation4 + $0x88] sm:$0xff]  ;;  %v3077_v62 = vcombine.high %v397_v51, %v401_v52 }
  0x48   :  { %v416_v47 = vld [vmem:[#allocation4 + $0xe0] sm:$0xff]  ;;  %v409_v58 = vld [vmem:[#allocation4 + $0xa8] sm:$0xff]  ;;  %v3076_v0 = vcombine.low %v397_v51, %v401_v52 }
  0x49   :  { %v3091_v53 = vcombine.high %v412_v46, %v416_v47  ;;  %v420_v54 = vld [vmem:[#allocation4 + $0x100] sm:$0xff]  ;;  %v3090_v59 = vcombine.low %v412_v46, %v416_v47  ;;  %v413_v1 = vld [vmem:[#allocation4 + $0xc8] sm:$0xff]  ;;  %v3085_v6 = vcombine.high %v405_v57, %v409_v58  ;;  %v3084_v8 = vcombine.low %v405_v57, %v409_v58 }
  0x4a   :  { %299 = vmatpush1.bf16.msra.mxu0 %v3540_v13  ;;  %342 = vmatpush1.bf16.msra.mxu1 %v3565_v28  ;;  %v424_v55 = vld [vmem:[#allocation4 + $0x120] sm:$0xff]  ;;  %v417_v2 = vld [vmem:[#allocation4 + $0xe8] sm:$0xff] }
  0x4b   :  { %300 = vmatprep.subr.bf16.mxu0 %v3541_v15  ;;  %343 = vmatprep.subr.bf16.mxu1 %v3566_v29  ;;  %v428_v60 = vld [vmem:[#allocation4 + $0x140] sm:$0xff]  ;;  %v3099_v63 = vcombine.high %v420_v54, %v424_v55  ;;  %v3098_v3 = vcombine.low %v420_v54, %v424_v55  ;;  %v421_v9 = vld [vmem:[#allocation4 + $0x108] sm:$0xff]  ;;  %v3093_v14 = vcombine.high %v413_v1, %v417_v2 }
  0x4c   :  { %v432_v61 = vld [vmem:[#allocation4 + $0x160] sm:$0xff]  ;;  %v425_v10 = vld [vmem:[#allocation4 + $0x128] sm:$0xff]  ;;  %v3092_v16 = vcombine.low %v413_v1, %v417_v2 }
  0x4d   :  { %v436_v4 = vld [vmem:[#allocation4 + $0x180] sm:$0xff]  ;;  %v3107_v7 = vcombine.high %v428_v60, %v432_v61  ;;  %v3106_v11 = vcombine.low %v428_v60, %v432_v61  ;;  %v433_v18 = vld [vmem:[#allocation4 + $0x168] sm:$0xff]  ;;  %v3101_v22 = vcombine.high %v421_v9, %v425_v10  ;;  %v3100_v24 = vcombine.low %v421_v9, %v425_v10 }
  0x4e   :  { %301 = vmatpush1.bf16.msra.mxu0 %v3543_v17  ;;  %344 = vmatpush1.bf16.msra.mxu1 %v3568_v34  ;;  %v440_v5 = vld [vmem:[#allocation4 + $0x1a0] sm:$0xff]  ;;  %v429_v17 = vld [vmem:[#allocation4 + $0x148] sm:$0xff] }
  0x4f   :  { %302 = vmatprep.subr.bf16.mxu0 %v3544_v19  ;;  %345 = vmatprep.subr.bf16.mxu1 %v3569_v36  ;;  %v444_v12 = vld [vmem:[#allocation4 + $0x1c0] sm:$0xff]  ;;  %v3115_v15 = vcombine.high %v436_v4, %v440_v5  ;;  %v3114_v19 = vcombine.low %v436_v4, %v440_v5  ;;  %v437_v25 = vld [vmem:[#allocation4 + $0x188] sm:$0xff]  ;;  %v3108_v32 = vcombine.low %v429_v17, %v433_v18 }
  0x50   :  { %v448_v13 = vld [vmem:[#allocation4 + $0x1e0] sm:$0xff]  ;;  %v441_v26 = vld [vmem:[#allocation4 + $0x1a8] sm:$0xff] }
  0x51   :  { %v452_v20 = vld [vmem:[#allocation4 + $0x200] sm:$0xff]  ;;  %v449_v34 = vld [vmem:[#allocation4 + $0x1e8] sm:$0xff]  ;;  %v3117_v38 = vcombine.high %v437_v25, %v441_v26 }
  0x52   :  { %303 = vmatpush1.bf16.msra.mxu0 %v3546_v21  ;;  %346 = vmatpush1.bf16.msra.mxu1 %v3571_v40  ;;  %v456_v21 = vld [vmem:[#allocation4 + $0x220] sm:$0xff]  ;;  %v3116_v40 = vcombine.low %v437_v25, %v441_v26  ;;  %v469_v57 = vld [vmem:[#allocation4 + $0x288] sm:$0xff] }
  0x53   :  { %304 = vmatprep.subr.bf16.mxu0 %v3547_v23  ;;  %347 = vmatprep.subr.bf16.mxu1 %v3572_v42  ;;  %v3123_v23 = vcombine.high %v444_v12, %v448_v13  ;;  %v460_v28 = vld [vmem:[#allocation4 + $0x240] sm:$0xff]  ;;  %v3131_v31 = vcombine.high %v452_v20, %v456_v21  ;;  %v457_v42 = vld [vmem:[#allocation4 + $0x228] sm:$0xff] }
  0x54   :  { %v464_v29 = vld [vmem:[#allocation4 + $0x260] sm:$0xff]  ;;  %v473_v58 = vld [vmem:[#allocation4 + $0x2a8] sm:$0xff] }
  0x55   :  { %v468_v36 = vld [vmem:[#allocation4 + $0x280] sm:$0xff]  ;;  %v3139_v39 = vcombine.high %v460_v28, %v464_v29  ;;  %v3138_v43 = vcombine.low %v460_v28, %v464_v29  ;;  %v477_v1 = vld [vmem:[#allocation4 + $0x2c8] sm:$0xff]  ;;  %v3149_v4 = vcombine.high %v469_v57, %v473_v58 }
  0x56   :  { %305 = vmatpush1.bf16.msra.mxu0 %v3549_v27  ;;  %348 = vmatpush1.bf16.msra.mxu1 %v3574_v48  ;;  %v3122_v27 = vcombine.low %v444_v12, %v448_v13  ;;  %v480_v45 = vld [vmem:[#allocation4 + $0x2e0] sm:$0xff]  ;;  %v481_v2 = vld [vmem:[#allocation4 + $0x2e8] sm:$0xff] }
  0x57   :  { %1966 = vmatprep.subr.bf16.mxu0 %v3067_v30  ;;  %2052 = vmatprep.subr.bf16.mxu1 %v3069_v50  ;;  %v3109_v30 = vcombine.high %v429_v17, %v433_v18  ;;  %v465_v50 = vld [vmem:[#allocation4 + $0x268] sm:$0xff]  ;;  %v484_v52 = vld [vmem:[#allocation4 + $0x300] sm:$0xff] }
  0x58   :  { %v492_v60 = vld [vmem:[#allocation4 + $0x340] sm:$0xff]  ;;  %v485_v9 = vld [vmem:[#allocation4 + $0x308] sm:$0xff] }
  0x59   :  { %323 = vmatmul.mubr.bf16.vlgmr.msra.gmra.mrb[0].mxu0 %v3550_v33  ;;  %366 = vmatmul.mubr.bf16.vlgmr.msra.gmra.mrb[0].mxu1 %v3550_v33  ;;  %v445_v33 = vld [vmem:[#allocation4 + $0x1c8] sm:$0xff]  ;;  %v496_v61 = vld [vmem:[#allocation4 + $0x360] sm:$0xff] }
  0x5a   :  { %1967 = vmatpush1.bf16.msra.mxu0 %v3066_v35  ;;  %2053 = vmatpush1.bf16.msra.mxu1 %v3068_v56  ;;  %v3130_v35 = vcombine.low %v452_v20, %v456_v21  ;;  %v3125_v46 = vcombine.high %v445_v33, %v449_v34  ;;  %v3124_v48 = vcombine.low %v445_v33, %v449_v34  ;;  %v489_v10 = vld [vmem:[#allocation4 + $0x328] sm:$0xff]  ;;  %v500_v18 = vld [vmem:[#allocation4 + $0x380] sm:$0xff] }
  0x5b   :  { %1968 = vmatprep.subr.bf16.mxu0 %v3075_v37  ;;  %2054 = vmatprep.subr.bf16.mxu1 %v3077_v62  ;;  %v472_v37 = vld [vmem:[#allocation4 + $0x2a0] sm:$0xff]  ;;  %v3171_v5 = vcombine.high %v492_v60, %v496_v61  ;;  %v3165_v12 = vcombine.high %v485_v9, %v489_v10  ;;  %v493_v13 = vld [vmem:[#allocation4 + $0x348] sm:$0xff] }
  0x5c   :  { %v3147_v47 = vcombine.high %v468_v36, %v472_v37  ;;  %v3146_v51 = vcombine.low %v468_v36, %v472_v37  ;;  %v501_v20 = vld [vmem:[#allocation4 + $0x388] sm:$0xff]  ;;  %v508_v26 = vld [vmem:[#allocation4 + $0x3c0] sm:$0xff] }
  0x5d   :  { %v509_v28 = vld [vmem:[#allocation4 + $0x3c8] sm:$0xff]  ;;  %v516_v34 = vld [vmem:[#allocation4 + $0x400] sm:$0xff] }
  0x5e   :  { %1969 = vmatpush1.bf16.msra.mxu0 %v3074_v41  ;;  %2055 = vmatpush1.bf16.msra.mxu1 %v3076_v0  ;;  %v453_v41 = vld [vmem:[#allocation4 + $0x208] sm:$0xff] }
  0x5f   :  { %1970 = vmatprep.subr.bf16.mxu0 %v3083_v44  ;;  %2056 = vmatprep.subr.bf16.mxu1 %v3085_v6  ;;  %v476_v44 = vld [vmem:[#allocation4 + $0x2c0] sm:$0xff]  ;;  %v3133_v54 = vcombine.high %v453_v41, %v457_v42  ;;  %v3132_v56 = vcombine.low %v453_v41, %v457_v42  ;;  %v3148_v6 = vcombine.low %v469_v57, %v473_v58  ;;  %v517_v36 = vld [vmem:[#allocation4 + $0x408] sm:$0xff]  ;;  %v104_v42 = vlaneseq }
  0x60   :  { %v3155_v55 = vcombine.high %v476_v44, %v480_v45 }
  0x62   :  { %1971 = vmatpush1.bf16.msra.mxu0 %v3082_v49  ;;  %2057 = vmatpush1.bf16.msra.mxu1 %v3084_v8  ;;  %v461_v49 = vld [vmem:[#allocation4 + $0x248] sm:$0xff]  ;;  %v3157_v8 = vcombine.high %v477_v1, %v481_v2 }
  0x63   :  { %1972 = vmatprep.subr.bf16.mxu0 %v3091_v53  ;;  %2058 = vmatprep.subr.bf16.mxu1 %v3093_v14  ;;  %v488_v53 = vld [vmem:[#allocation4 + $0x320] sm:$0xff]  ;;  %v3141_v62 = vcombine.high %v461_v49, %v465_v50  ;;  %v3140_v0 = vcombine.low %v461_v49, %v465_v50  ;;  %v497_v14 = vld [vmem:[#allocation4 + $0x368] sm:$0xff] }
  0x64   :  { %v3172_v17 = vcombine.low %v493_v13, %v497_v14 }
  0x66   :  { %1973 = vmatpush1.bf16.msra.mxu0 %v3090_v59  ;;  %2059 = vmatpush1.bf16.msra.mxu1 %v3092_v16  ;;  %v3154_v59 = vcombine.low %v476_v44, %v480_v45  ;;  %v3173_v16 = vcombine.high %v493_v13, %v497_v14  ;;  %v102_v45 = vld [vmem:[%s3872_s2] sm:$0xf] }
  0x67   :  { %1974 = vmatprep.subr.bf16.mxu0 %v3099_v63  ;;  %2060 = vmatprep.subr.bf16.mxu1 %v3101_v22  ;;  %v3163_v63 = vcombine.high %v484_v52, %v488_v53  ;;  %v505_v22 = vld [vmem:[#allocation4 + $0x3a8] sm:$0xff] }
  0x68   :  { %v3181_v25 = vcombine.high %v501_v20, %v505_v22 }
  0x6a   :  { %1975 = vmatpush1.bf16.msra.mxu0 %v3098_v3  ;;  %2061 = vmatpush1.bf16.msra.mxu1 %v3100_v24  ;;  %v3162_v3 = vcombine.low %v484_v52, %v488_v53  ;;  %v3180_v24 = vcombine.low %v501_v20, %v505_v22  ;;  %v541_v22 = vld [vmem:[#allocation4 + $0x4c8] sm:$0xff] }
  0x6b   :  { %1976 = vmatprep.subr.bf16.mxu0 %v3107_v7  ;;  %2062 = vmatprep.subr.bf16.mxu1 %v3109_v30  ;;  %v3170_v7 = vcombine.low %v492_v60, %v496_v61  ;;  %v513_v30 = vld [vmem:[#allocation4 + $0x3e8] sm:$0xff] }
  0x6c   :  { %v3189_v33 = vcombine.high %v509_v28, %v513_v30 }
  0x6e   :  { %1977 = vmatpush1.bf16.msra.mxu0 %v3106_v11  ;;  %2063 = vmatpush1.bf16.msra.mxu1 %v3108_v32  ;;  %v3156_v11 = vcombine.low %v477_v1, %v481_v2  ;;  %v3188_v32 = vcombine.low %v509_v28, %v513_v30  ;;  %v529_v1 = vld [vmem:[#allocation4 + $0x468] sm:$0xff] }
  0x6f   :  { %1978 = vmatprep.subr.bf16.mxu0 %v3115_v15  ;;  %2064 = vmatprep.subr.bf16.mxu1 %v3117_v38  ;;  %v3164_v15 = vcombine.low %v485_v9, %v489_v10  ;;  %v521_v38 = vld [vmem:[#allocation4 + $0x428] sm:$0xff]  ;;  %v536_v9 = vld [vmem:[#allocation4 + $0x4a0] sm:$0xff] }
  0x70   :  { %v3197_v41 = vcombine.high %v517_v36, %v521_v38  ;;  %v533_v10 = vld [vmem:[#allocation4 + $0x488] sm:$0xff] }
  0x72   :  { %1979 = vmatpush1.bf16.msra.mxu0 %v3114_v19  ;;  %2065 = vmatpush1.bf16.msra.mxu1 %v3116_v40  ;;  %v504_v19 = vld [vmem:[#allocation4 + $0x3a0] sm:$0xff]  ;;  %v3196_v40 = vcombine.low %v517_v36, %v521_v38  ;;  %v549_v38 = vld [vmem:[#allocation4 + $0x508] sm:$0xff] }
  0x73   :  { %1980 = vmatprep.subr.bf16.mxu0 %v3123_v23  ;;  %2066 = vmatprep.subr.bf16.mxu1 %v3125_v46  ;;  %v3179_v21 = vcombine.high %v500_v18, %v504_v19  ;;  %v3178_v23 = vcombine.low %v500_v18, %v504_v19  ;;  %v540_v18 = vld [vmem:[#allocation4 + $0x4c0] sm:$0xff] }
  0x76   :  { %1981 = vmatpush1.bf16.msra.mxu0 %v3122_v27  ;;  %2067 = vmatpush1.bf16.msra.mxu1 %v3124_v48  ;;  %v512_v27 = vld [vmem:[#allocation4 + $0x3e0] sm:$0xff] }
  0x77   :  { %1982 = vmatprep.subr.bf16.mxu0 %v3131_v31  ;;  %2068 = vmatprep.subr.bf16.mxu1 %v3133_v54  ;;  %v3187_v29 = vcombine.high %v508_v26, %v512_v27  ;;  %v3186_v31 = vcombine.low %v508_v26, %v512_v27 }
  0x7a   :  { %1983 = vmatpush1.bf16.msra.mxu0 %v3130_v35  ;;  %2069 = vmatpush1.bf16.msra.mxu1 %v3132_v56  ;;  %v520_v35 = vld [vmem:[#allocation4 + $0x420] sm:$0xff] }
  0x7b   :  { %1984 = vmatprep.subr.bf16.mxu0 %v3139_v39  ;;  %2070 = vmatprep.subr.bf16.mxu1 %v3141_v62  ;;  %v3195_v37 = vcombine.high %v516_v34, %v520_v35  ;;  %v3194_v39 = vcombine.low %v516_v34, %v520_v35  ;;  %v548_v35 = vld [vmem:[#allocation4 + $0x500] sm:$0xff] }
  0x7e   :  { %1985 = vmatpush1.bf16.msra.mxu0 %v3138_v43  ;;  %2071 = vmatpush1.bf16.msra.mxu1 %v3140_v0  ;;  %v3798_v43 = vshrl.u32 %v104_v42, 7  ;;  %v525_v0 = vld [vmem:[#allocation4 + $0x448] sm:$0xff] }
  0x7f   :  { %1986 = vmatprep.subr.bf16.mxu0 %v3147_v47  ;;  %2072 = vmatprep.subr.bf16.mxu1 %v3149_v4  ;;  %v3204_v14 = vcombine.low %v525_v0, %v529_v1 }
  0x80   :  { %v106_v44 = vsub.s32 0, %v3798_v43  ;;  %v110_v46 = vsub.s32 1, %v3798_v43  ;;  %v114_v60 = vsub.s32 2, %v3798_v43  ;;  %v118_v2 = vsub.s32 3, %v3798_v43 }
  0x82   :  { %1987 = vmatpush1.bf16.msra.mxu0 %v3146_v51  ;;  %2073 = vmatpush1.bf16.msra.mxu1 %v3148_v6  ;;  %v107_v47 = vrot.slane %v102_v45, %v106_v44  ;;  %v111_v48 = vrot.slane %v102_v45, %v110_v46  ;;  %v3205_v6 = vcombine.high %v525_v0, %v529_v1 }
  0x83   :  { %1988 = vmatprep.subr.bf16.mxu0 %v3155_v55  ;;  %2074 = vmatprep.subr.bf16.mxu1 %v3157_v8  ;;  %v115_v8 = vrot.slane %v102_v45, %v114_v60 }
  0x86   :  { %1989 = vmatpush1.bf16.msra.mxu0 %v3154_v59  ;;  %2075 = vmatpush1.bf16.msra.mxu1 %v3156_v11  ;;  %v524_v59 = vld [vmem:[#allocation4 + $0x440] sm:$0xff]  ;;  %v537_v11 = vld [vmem:[#allocation4 + $0x4a8] sm:$0xff] }
  0x87   :  { %1990 = vmatprep.subr.bf16.mxu0 %v3163_v63  ;;  %2076 = vmatprep.subr.bf16.mxu1 %v3165_v12  ;;  %v528_v63 = vld [vmem:[#allocation4 + $0x460] sm:$0xff]  ;;  %v119_v12 = vrot.slane %v102_v45, %v118_v2  ;;  %v3212_v30 = vcombine.low %v533_v10, %v537_v11 }
  0x88   :  { %v3202_v13 = vcombine.low %v524_v59, %v528_v63 }
  0x8a   :  { %1991 = vmatpush1.bf16.msra.mxu0 %v3162_v3  ;;  %2077 = vmatpush1.bf16.msra.mxu1 %v3164_v15 }
  0x8b   :  { %1992 = vmatprep.subr.bf16.mxu0 %v3171_v5  ;;  %2078 = vmatprep.subr.bf16.mxu1 %v3173_v16  ;;  %v3203_v5 = vcombine.high %v524_v59, %v528_v63  ;;  %v568_v59 = vld [vmem:[#allocation4 + $0x5a0] sm:$0xff] }
  0x8e   :  { %1993 = vmatpush1.bf16.msra.mxu0 %v3170_v7  ;;  %2079 = vmatpush1.bf16.msra.mxu1 %v3172_v17  ;;  %v532_v7 = vld [vmem:[#allocation4 + $0x480] sm:$0xff]  ;;  %v3213_v17 = vcombine.high %v533_v10, %v537_v11 }
  0x8f   :  { %1994 = vmatprep.subr.bf16.mxu0 %v3179_v21  ;;  %2080 = vmatprep.subr.bf16.mxu1 %v3181_v25  ;;  %v3211_v16 = vcombine.high %v532_v7, %v536_v9  ;;  %v544_v21 = vld [vmem:[#allocation4 + $0x4e0] sm:$0xff] }
  0x90   :  { %v3218_v42 = vcombine.low %v540_v18, %v544_v21 }
  0x92   :  { %1995 = vmatpush1.bf16.msra.mxu0 %v3178_v23  ;;  %2081 = vmatpush1.bf16.msra.mxu1 %v3180_v24  ;;  %v545_v23 = vld [vmem:[#allocation4 + $0x4e8] sm:$0xff] }
  0x93   :  { %1996 = vmatprep.subr.bf16.mxu0 %v3187_v29  ;;  %2082 = vmatprep.subr.bf16.mxu1 %v3189_v33  ;;  %v3210_v29 = vcombine.low %v532_v7, %v536_v9  ;;  %v3219_v33 = vcombine.high %v540_v18, %v544_v21  ;;  %v3221_v34 = vcombine.high %v541_v22, %v545_v23  ;;  %v576_v7 = vld [vmem:[#allocation4 + $0x5e0] sm:$0xff]  ;;  %v577_v9 = vld [vmem:[#allocation4 + $0x5e8] sm:$0xff] }
  0x94   :  { %v3220_v45 = vcombine.low %v541_v22, %v545_v23  ;;  %v588_v22 = vld [vmem:[#allocation4 + $0x640] sm:$0xff] }
  0x95   :  { %v592_v23 = vld [vmem:[#allocation4 + $0x660] sm:$0xff] }
  0x96   :  { %1997 = vmatpush1.bf16.msra.mxu0 %v3186_v31  ;;  %2083 = vmatpush1.bf16.msra.mxu1 %v3188_v32 }
  0x97   :  { %2009 = vmatprep.subr.bf16.mxu0 %v3195_v37  ;;  %2095 = vmatprep.subr.bf16.mxu1 %v3197_v41  ;;  %v552_v37 = vld [vmem:[#allocation4 + $0x520] sm:$0xff] }
 0x12c   :  { %v324_v49 = vpop.f32.mrb[0].mxu0  ;;  %v367_v15 = vpop.f32.mrb[0].mxu1 }
 0x12d   :  { %v325_v50 = vadd.f32 %v324_v49, %v107_v47  ;;  %v326_v51 = vpop.f32.mrb[1].mxu0  ;;  %v368_v19 = vadd.f32 %v367_v15, %v115_v8  ;;  %v369_v20 = vpop.f32.mrb[1].mxu1  ;;  %v584_v15 = vld [vmem:[#allocation4 + $0x620] sm:$0xff] }
 0x12e   :  { %v327_v52 = vadd.f32 %v326_v51, %v111_v48  ;;  %v328_v53 = vpop.f32.mrb[2].mxu0  ;;  %v370_v24 = vadd.f32 %v369_v20, %v119_v12  ;;  %v371_v25 = vpop.f32.mrb[2].mxu1  ;;  %v560_v51 = vld [vmem:[#allocation4 + $0x560] sm:$0xff] }
 0x12f   :  { %v329_v54 = vadd.f32 %v328_v53, %v107_v47  ;;  %v330_v55 = vpop.f32.mrb[3].mxu0  ;;  %v376_v57 = vmax.f32 %v325_v50, 0.0  ;;  %v378_v26 = vmax.f32 %v368_v19, 0.0  ;;  %v372_v27 = vadd.f32 %v371_v25, %v115_v8  ;;  %v373_v28 = vpop.f32.mrb[3].mxu1  ;;  %v556_v50 = vld [vmem:[#allocation4 + $0x540] sm:$0xff]  ;;  %v561_v53 = vld [vmem:[#allocation4 + $0x568] sm:$0xff] }
 0x130   :  { %v331_v56 = vadd.f32 %v330_v55, %v111_v48  ;;  %v377_v61 = vmax.f32 %v327_v52, 0.0  ;;  %v379_v31 = vmax.f32 %v370_v24, 0.0  ;;  %v374_v32 = vadd.f32 %v373_v28, %v119_v12  ;;  %v557_v52 = vld [vmem:[#allocation4 + $0x548] sm:$0xff] }
 0x131   :  { %v380_v58 = vmax.f32 %v329_v54, 0.0  ;;  %v382_v36 = vmax.f32 %v372_v27, 0.0  ;;  %v3227_v48 = vcombine.high %v548_v35, %v552_v37  ;;  %v3226_v54 = vcombine.low %v548_v35, %v552_v37  ;;  %v573_v8 = vld [vmem:[#allocation4 + $0x5c8] sm:$0xff] }
 0x132   :  { %v381_v62 = vmax.f32 %v331_v56, 0.0  ;;  %v3235_v56 = vcombine.high %v556_v50, %v560_v51  ;;  %v3234_v63 = vcombine.low %v556_v50, %v560_v51  ;;  %v3236_v0 = vcombine.low %v557_v52, %v561_v53  ;;  %v589_v24 = vld [vmem:[#allocation4 + $0x648] sm:$0xff]  ;;  %v612_v51 = vld [vmem:[#allocation4 + $0x700] sm:$0xff] }
 0x133   :  { %v3811_v3 = vpack.c.bf16 %v380_v58, %v376_v57  ;;  %v3823_v41 = vpack.c.bf16 %v382_v36, %v378_v26  ;;  %v3237_v57 = vcombine.high %v557_v52, %v561_v53  ;;  %v564_v58 = vld [vmem:[#allocation4 + $0x580] sm:$0xff]  ;;  %v3252_v19 = vcombine.low %v573_v8, %v577_v9  ;;  %v593_v25 = vld [vmem:[#allocation4 + $0x668] sm:$0xff] }
 0x134   :  { %v3813_v4 = vpack.c.bf16 %v381_v62, %v377_v61  ;;  %v565_v61 = vld [vmem:[#allocation4 + $0x588] sm:$0xff]  ;;  %v3243_v1 = vcombine.high %v564_v58, %v568_v59  ;;  %v3242_v10 = vcombine.low %v564_v58, %v568_v59  ;;  %v3267_v28 = vcombine.high %v588_v22, %v592_v23  ;;  %v616_v52 = vld [vmem:[#allocation4 + $0x720] sm:$0xff] }
 0x135   :  { %v569_v62 = vld [vmem:[#allocation4 + $0x5a8] sm:$0xff]  ;;  %v3268_v35 = vcombine.low %v589_v24, %v593_v25  ;;  %v620_v59 = vld [vmem:[#allocation4 + $0x740] sm:$0xff] }
 0x136   :  { %1998 = vmatprep.mubr.bf16.mxu0 %v3813_v4  ;;  %2084 = vmatprep.mubr.bf16.mxu1 %v3813_v4  ;;  %v3244_v11 = vcombine.low %v565_v61, %v569_v62  ;;  %v613_v53 = vld [vmem:[#allocation4 + $0x708] sm:$0xff] }
 0x137   :  { %1999 = vmatmul.mubr.bf16.vlgmr.msra.gmra.mrb[4].mxu0 %v3811_v3  ;;  %2085 = vmatmul.mubr.bf16.vlgmr.msra.gmra.mrb[4].mxu1 %v3811_v3 }
 0x138   :  { %2010 = vmatpush1.bf16.msra.mxu0 %v3194_v39  ;;  %2096 = vmatpush1.bf16.msra.mxu1 %v3196_v40  ;;  %v553_v39 = vld [vmem:[#allocation4 + $0x528] sm:$0xff]  ;;  %v383_v40 = vmax.f32 %v374_v32, 0.0 }
 0x139   :  { %2011 = vmatprep.subr.bf16.mxu0 %v3203_v5  ;;  %2097 = vmatprep.subr.bf16.mxu1 %v3205_v6  ;;  %v3229_v49 = vcombine.high %v549_v38, %v553_v39  ;;  %v3228_v55 = vcombine.low %v549_v38, %v553_v39  ;;  %v3245_v5 = vcombine.high %v565_v61, %v569_v62  ;;  %v572_v6 = vld [vmem:[#allocation4 + $0x5c0] sm:$0xff]  ;;  %v597_v32 = vld [vmem:[#allocation4 + $0x688] sm:$0xff] }
 0x13a   :  { %v3825_v47 = vpack.c.bf16 %v383_v40, %v379_v31  ;;  %v3251_v12 = vcombine.high %v572_v6, %v576_v7  ;;  %v3250_v18 = vcombine.low %v572_v6, %v576_v7  ;;  %v600_v31 = vld [vmem:[#allocation4 + $0x6a0] sm:$0xff]  ;;  %v605_v40 = vld [vmem:[#allocation4 + $0x6c8] sm:$0xff] }
 0x13b   :  { %v604_v38 = vld [vmem:[#allocation4 + $0x6c0] sm:$0xff]  ;;  %v621_v62 = vld [vmem:[#allocation4 + $0x748] sm:$0xff] }
 0x13c   :  { %2012 = vmatpush1.bf16.msra.mxu0 %v3202_v13  ;;  %2098 = vmatpush1.bf16.msra.mxu1 %v3204_v14  ;;  %v3253_v13 = vcombine.high %v573_v8, %v577_v9  ;;  %v580_v14 = vld [vmem:[#allocation4 + $0x600] sm:$0xff]  ;;  %v629_v9 = vld [vmem:[#allocation4 + $0x788] sm:$0xff] }
 0x13d   :  { %2013 = vmatprep.subr.bf16.mxu0 %v3211_v16  ;;  %2099 = vmatprep.subr.bf16.mxu1 %v3213_v17  ;;  %v581_v16 = vld [vmem:[#allocation4 + $0x608] sm:$0xff]  ;;  %v3259_v20 = vcombine.high %v580_v14, %v584_v15  ;;  %v3258_v26 = vcombine.low %v580_v14, %v584_v15  ;;  %v608_v39 = vld [vmem:[#allocation4 + $0x6e0] sm:$0xff] }
 0x13e   :  { %2041 = vmatprep.mubr.bf16.mxu0 %v3825_v47  ;;  %2127 = vmatprep.mubr.bf16.mxu1 %v3825_v47  ;;  %v585_v17 = vld [vmem:[#allocation4 + $0x628] sm:$0xff]  ;;  %v624_v61 = vld [vmem:[#allocation4 + $0x760] sm:$0xff] }
 0x13f   :  { %v3261_v21 = vcombine.high %v581_v16, %v585_v17  ;;  %v3260_v27 = vcombine.low %v581_v16, %v585_v17  ;;  %v628_v7 = vld [vmem:[#allocation4 + $0x780] sm:$0xff]  ;;  %v637_v17 = vld [vmem:[#allocation4 + $0x7c8] sm:$0xff] }
 0x140   :  { %2014 = vmatpush1.bf16.msra.mxu0 %v3210_v29  ;;  %2100 = vmatpush1.bf16.msra.mxu1 %v3212_v30  ;;  %v3269_v29 = vcombine.high %v589_v24, %v593_v25  ;;  %v596_v30 = vld [vmem:[#allocation4 + $0x680] sm:$0xff]  ;;  %v394_v24 = vld [vmem:[#allocation4 + $0x30] sm:$0xff]  ;;  %v391_v25 = vld [vmem:[#allocation4 + $0x18] sm:$0xff] }
 0x141   :  { %2015 = vmatprep.subr.bf16.mxu0 %v3219_v33  ;;  %2101 = vmatprep.subr.bf16.mxu1 %v3221_v34  ;;  %v601_v33 = vld [vmem:[#allocation4 + $0x6a8] sm:$0xff]  ;;  %v3266_v34 = vcombine.low %v588_v22, %v592_v23  ;;  %v3275_v36 = vcombine.high %v596_v30, %v600_v31  ;;  %v632_v8 = vld [vmem:[#allocation4 + $0x7a0] sm:$0xff]  ;;  %v390_v23 = vld [vmem:[#allocation4 + $0x10] sm:$0xff] }
 0x142   :  { %v3277_v37 = vcombine.high %v597_v32, %v601_v33  ;;  %v636_v15 = vld [vmem:[#allocation4 + $0x7c0] sm:$0xff] }
 0x143   :  { %v640_v16 = vld [vmem:[#allocation4 + $0x7e0] sm:$0xff] }
 0x144   :  { %2016 = vmatpush1.bf16.msra.mxu0 %v3218_v42  ;;  %2102 = vmatpush1.bf16.msra.mxu1 %v3220_v45  ;;  %v609_v42 = vld [vmem:[#allocation4 + $0x6e8] sm:$0xff]  ;;  %v3274_v45 = vcombine.low %v596_v30, %v600_v31  ;;  %v398_v31 = vld [vmem:[#allocation4 + $0x50] sm:$0xff] }
 0x145   :  { %2017 = vmatprep.subr.bf16.mxu0 %v3227_v48  ;;  %2103 = vmatprep.subr.bf16.mxu1 %v3229_v49  ;;  %v3276_v48 = vcombine.low %v597_v32, %v601_v33  ;;  %v3283_v49 = vcombine.high %v604_v38, %v608_v39  ;;  %v3285_v50 = vcombine.high %v605_v40, %v609_v42  ;;  %v402_v32 = vld [vmem:[#allocation4 + $0x70] sm:$0xff]  ;;  %v399_v33 = vld [vmem:[#allocation4 + $0x58] sm:$0xff] }
 0x148   :  { %2018 = vmatpush1.bf16.msra.mxu0 %v3226_v54  ;;  %2104 = vmatpush1.bf16.msra.mxu1 %v3228_v55  ;;  %v617_v54 = vld [vmem:[#allocation4 + $0x728] sm:$0xff]  ;;  %v3282_v55 = vcombine.low %v604_v38, %v608_v39  ;;  %v406_v39 = vld [vmem:[#allocation4 + $0x90] sm:$0xff] }
 0x149   :  { %2019 = vmatprep.subr.bf16.mxu0 %v3235_v56  ;;  %2105 = vmatprep.subr.bf16.mxu1 %v3237_v57  ;;  %v3284_v56 = vcombine.low %v605_v40, %v609_v42  ;;  %v3291_v57 = vcombine.high %v612_v51, %v616_v52  ;;  %v3293_v58 = vcombine.high %v613_v53, %v617_v54  ;;  %v410_v40 = vld [vmem:[#allocation4 + $0xb0] sm:$0xff]  ;;  %v407_v42 = vld [vmem:[#allocation4 + $0x98] sm:$0xff] }
 0x14c   :  { %2020 = vmatpush1.bf16.msra.mxu0 %v3234_v63  ;;  %2106 = vmatpush1.bf16.msra.mxu1 %v3236_v0  ;;  %v625_v63 = vld [vmem:[#allocation4 + $0x768] sm:$0xff]  ;;  %v3290_v0 = vcombine.low %v612_v51, %v616_v52  ;;  %v414_v52 = vld [vmem:[#allocation4 + $0xd0] sm:$0xff] }
 0x14d   :  { %2021 = vmatprep.subr.bf16.mxu0 %v3243_v1  ;;  %2107 = vmatprep.subr.bf16.mxu1 %v3245_v5  ;;  %v3292_v1 = vcombine.low %v613_v53, %v617_v54  ;;  %v3299_v5 = vcombine.high %v620_v59, %v624_v61  ;;  %v3301_v6 = vcombine.high %v621_v62, %v625_v63  ;;  %v418_v53 = vld [vmem:[#allocation4 + $0xf0] sm:$0xff]  ;;  %v415_v54 = vld [vmem:[#allocation4 + $0xd8] sm:$0xff] }
 0x150   :  { %2022 = vmatpush1.bf16.msra.mxu0 %v3242_v10  ;;  %2108 = vmatpush1.bf16.msra.mxu1 %v3244_v11  ;;  %v633_v10 = vld [vmem:[#allocation4 + $0x7a8] sm:$0xff]  ;;  %v3298_v11 = vcombine.low %v620_v59, %v624_v61  ;;  %v422_v61 = vld [vmem:[#allocation4 + $0x110] sm:$0xff] }
 0x151   :  { %2023 = vmatprep.subr.bf16.mxu0 %v3251_v12  ;;  %2109 = vmatprep.subr.bf16.mxu1 %v3253_v13  ;;  %v3300_v12 = vcombine.low %v621_v62, %v625_v63  ;;  %v3307_v13 = vcombine.high %v628_v7, %v632_v8  ;;  %v3309_v14 = vcombine.high %v629_v9, %v633_v10  ;;  %v426_v62 = vld [vmem:[#allocation4 + $0x130] sm:$0xff]  ;;  %v427_v63 = vld [vmem:[#allocation4 + $0x138] sm:$0xff] }
 0x154   :  { %2024 = vmatpush1.bf16.msra.mxu0 %v3250_v18  ;;  %2110 = vmatpush1.bf16.msra.mxu1 %v3252_v19  ;;  %v641_v18 = vld [vmem:[#allocation4 + $0x7e8] sm:$0xff]  ;;  %v3306_v19 = vcombine.low %v628_v7, %v632_v8  ;;  %v430_v7 = vld [vmem:[#allocation4 + $0x150] sm:$0xff] }
 0x155   :  { %2025 = vmatprep.subr.bf16.mxu0 %v3259_v20  ;;  %2111 = vmatprep.subr.bf16.mxu1 %v3261_v21  ;;  %v3308_v20 = vcombine.low %v629_v9, %v633_v10  ;;  %v3315_v21 = vcombine.high %v636_v15, %v640_v16  ;;  %v3317_v22 = vcombine.high %v637_v17, %v641_v18  ;;  %v434_v8 = vld [vmem:[#allocation4 + $0x170] sm:$0xff]  ;;  %v431_v9 = vld [vmem:[#allocation4 + $0x158] sm:$0xff] }
 0x156   :  { %v435_v10 = vld [vmem:[#allocation4 + $0x178] sm:$0xff] }
 0x158   :  { %2026 = vmatpush1.bf16.msra.mxu0 %v3258_v26  ;;  %2112 = vmatpush1.bf16.msra.mxu1 %v3260_v27  ;;  %v395_v26 = vld [vmem:[#allocation4 + $0x38] sm:$0xff]  ;;  %v3314_v27 = vcombine.low %v636_v15, %v640_v16  ;;  %v438_v15 = vld [vmem:[#allocation4 + $0x190] sm:$0xff] }
 0x159   :  { %2027 = vmatprep.subr.bf16.mxu0 %v3267_v28  ;;  %2113 = vmatprep.subr.bf16.mxu1 %v3269_v29  ;;  %v3316_v28 = vcombine.low %v637_v17, %v641_v18  ;;  %v3071_v29 = vcombine.high %v390_v23, %v394_v24  ;;  %v3073_v30 = vcombine.high %v391_v25, %v395_v26  ;;  %v442_v16 = vld [vmem:[#allocation4 + $0x1b0] sm:$0xff]  ;;  %v439_v17 = vld [vmem:[#allocation4 + $0x198] sm:$0xff] }
 0x15a   :  { %v443_v18 = vld [vmem:[#allocation4 + $0x1b8] sm:$0xff] }
 0x15c   :  { %2028 = vmatpush1.bf16.msra.mxu0 %v3266_v34  ;;  %2114 = vmatpush1.bf16.msra.mxu1 %v3268_v35  ;;  %v403_v34 = vld [vmem:[#allocation4 + $0x78] sm:$0xff]  ;;  %v3070_v35 = vcombine.low %v390_v23, %v394_v24  ;;  %v446_v23 = vld [vmem:[#allocation4 + $0x1d0] sm:$0xff] }
 0x15d   :  { %2029 = vmatprep.subr.bf16.mxu0 %v3275_v36  ;;  %2115 = vmatprep.subr.bf16.mxu1 %v3277_v37  ;;  %v3072_v36 = vcombine.low %v391_v25, %v395_v26  ;;  %v3079_v37 = vcombine.high %v398_v31, %v402_v32  ;;  %v3081_v38 = vcombine.high %v399_v33, %v403_v34  ;;  %v450_v24 = vld [vmem:[#allocation4 + $0x1f0] sm:$0xff]  ;;  %v447_v25 = vld [vmem:[#allocation4 + $0x1d8] sm:$0xff] }
 0x15e   :  { %v451_v26 = vld [vmem:[#allocation4 + $0x1f8] sm:$0xff] }
 0x160   :  { %2030 = vmatpush1.bf16.msra.mxu0 %v3274_v45  ;;  %2116 = vmatpush1.bf16.msra.mxu1 %v3276_v48  ;;  %v411_v45 = vld [vmem:[#allocation4 + $0xb8] sm:$0xff]  ;;  %v3078_v48 = vcombine.low %v398_v31, %v402_v32  ;;  %v454_v31 = vld [vmem:[#allocation4 + $0x210] sm:$0xff] }
 0x161   :  { %2031 = vmatprep.subr.bf16.mxu0 %v3283_v49  ;;  %2117 = vmatprep.subr.bf16.mxu1 %v3285_v50  ;;  %v3080_v49 = vcombine.low %v399_v33, %v403_v34  ;;  %v3087_v50 = vcombine.high %v406_v39, %v410_v40  ;;  %v3089_v51 = vcombine.high %v407_v42, %v411_v45  ;;  %v458_v32 = vld [vmem:[#allocation4 + $0x230] sm:$0xff]  ;;  %v455_v33 = vld [vmem:[#allocation4 + $0x218] sm:$0xff] }
 0x162   :  { %v459_v34 = vld [vmem:[#allocation4 + $0x238] sm:$0xff] }
 0x164   :  { %2032 = vmatpush1.bf16.msra.mxu0 %v3282_v55  ;;  %2118 = vmatpush1.bf16.msra.mxu1 %v3284_v56  ;;  %v419_v55 = vld [vmem:[#allocation4 + $0xf8] sm:$0xff]  ;;  %v3086_v56 = vcombine.low %v406_v39, %v410_v40  ;;  %v462_v39 = vld [vmem:[#allocation4 + $0x250] sm:$0xff] }
 0x165   :  { %2033 = vmatprep.subr.bf16.mxu0 %v3291_v57  ;;  %2119 = vmatprep.subr.bf16.mxu1 %v3293_v58  ;;  %v3088_v57 = vcombine.low %v407_v42, %v411_v45  ;;  %v3095_v58 = vcombine.high %v414_v52, %v418_v53  ;;  %v3097_v59 = vcombine.high %v415_v54, %v419_v55  ;;  %v466_v40 = vld [vmem:[#allocation4 + $0x270] sm:$0xff]  ;;  %v463_v42 = vld [vmem:[#allocation4 + $0x258] sm:$0xff] }
 0x166   :  { %v467_v45 = vld [vmem:[#allocation4 + $0x278] sm:$0xff] }
 0x168   :  { %2034 = vmatpush1.bf16.msra.mxu0 %v3290_v0  ;;  %2120 = vmatpush1.bf16.msra.mxu1 %v3292_v1  ;;  %v3094_v0 = vcombine.low %v414_v52, %v418_v53  ;;  %v3096_v1 = vcombine.low %v415_v54, %v419_v55  ;;  %v470_v52 = vld [vmem:[#allocation4 + $0x290] sm:$0xff]  ;;  %v471_v54 = vld [vmem:[#allocation4 + $0x298] sm:$0xff] }
 0x169   :  { %2035 = vmatprep.subr.bf16.mxu0 %v3299_v5  ;;  %2121 = vmatprep.subr.bf16.mxu1 %v3301_v6  ;;  %v3103_v5 = vcombine.high %v422_v61, %v426_v62  ;;  %v474_v53 = vld [vmem:[#allocation4 + $0x2b0] sm:$0xff]  ;;  %v475_v55 = vld [vmem:[#allocation4 + $0x2b8] sm:$0xff] }
 0x16c   :  { %2036 = vmatpush1.bf16.msra.mxu0 %v3298_v11  ;;  %2122 = vmatpush1.bf16.msra.mxu1 %v3300_v12  ;;  %v3102_v11 = vcombine.low %v422_v61, %v426_v62  ;;  %v478_v61 = vld [vmem:[#allocation4 + $0x2d0] sm:$0xff] }
 0x16d   :  { %2037 = vmatprep.subr.bf16.mxu0 %v3307_v13  ;;  %2123 = vmatprep.subr.bf16.mxu1 %v3309_v14  ;;  %v3111_v13 = vcombine.high %v430_v7, %v434_v8  ;;  %v3113_v14 = vcombine.high %v431_v9, %v435_v10  ;;  %v482_v62 = vld [vmem:[#allocation4 + $0x2f0] sm:$0xff] }
 0x170   :  { %2038 = vmatpush1.bf16.msra.mxu0 %v3306_v19  ;;  %2124 = vmatpush1.bf16.msra.mxu1 %v3308_v20  ;;  %v3110_v19 = vcombine.low %v430_v7, %v434_v8  ;;  %v3112_v20 = vcombine.low %v431_v9, %v435_v10  ;;  %v486_v7 = vld [vmem:[#allocation4 + $0x310] sm:$0xff]  ;;  %v487_v9 = vld [vmem:[#allocation4 + $0x318] sm:$0xff] }
 0x171   :  { %2039 = vmatprep.subr.bf16.mxu0 %v3315_v21  ;;  %2125 = vmatprep.subr.bf16.mxu1 %v3317_v22  ;;  %v3119_v21 = vcombine.high %v438_v15, %v442_v16  ;;  %v3121_v22 = vcombine.high %v439_v17, %v443_v18  ;;  %v490_v8 = vld [vmem:[#allocation4 + $0x330] sm:$0xff]  ;;  %v491_v10 = vld [vmem:[#allocation4 + $0x338] sm:$0xff] }
 0x174   :  { %2040 = vmatpush1.bf16.msra.mxu0 %v3314_v27  ;;  %2126 = vmatpush1.bf16.msra.mxu1 %v3316_v28  ;;  %v3118_v27 = vcombine.low %v438_v15, %v442_v16  ;;  %v3120_v28 = vcombine.low %v439_v17, %v443_v18  ;;  %v494_v15 = vld [vmem:[#allocation4 + $0x350] sm:$0xff]  ;;  %v495_v17 = vld [vmem:[#allocation4 + $0x358] sm:$0xff] }
 0x175   :  { %2138 = vmatprep.subr.bf16.mxu0 %v3071_v29  ;;  %2224 = vmatprep.subr.bf16.mxu1 %v3073_v30  ;;  %v3127_v29 = vcombine.high %v446_v23, %v450_v24  ;;  %v3129_v30 = vcombine.high %v447_v25, %v451_v26  ;;  %v498_v16 = vld [vmem:[#allocation4 + $0x370] sm:$0xff]  ;;  %v499_v18 = vld [vmem:[#allocation4 + $0x378] sm:$0xff] }
 0x177   :  { %2042 = vmatmul.mubr.bf16.vlgmr.msra.gmra.mrb[4].mxu0 %v3823_v41  ;;  %2128 = vmatmul.mubr.bf16.vlgmr.msra.gmra.mrb[4].mxu1 %v3823_v41 }
 0x178   :  { %2139 = vmatpush1.bf16.msra.mxu0 %v3070_v35  ;;  %2170 = vmatprep.mubr.bf16.mxu0 %v3813_v4  ;;  %v3126_v35 = vcombine.low %v446_v23, %v450_v24  ;;  %v502_v23 = vld [vmem:[#allocation4 + $0x390] sm:$0xff] }
 0x179   :  { %2225 = vmatpush1.bf16.msra.mxu1 %v3072_v36  ;;  %2256 = vmatprep.mubr.bf16.mxu1 %v3813_v4  ;;  %v423_v4 = vld [vmem:[#allocation4 + $0x118] sm:$0xff]  ;;  %v3128_v36 = vcombine.low %v447_v25, %v451_v26  ;;  %v506_v24 = vld [vmem:[#allocation4 + $0x3b0] sm:$0xff] }
 0x17a   :  { %2140 = vmatprep.subr.bf16.mxu0 %v3079_v37  ;;  %2226 = vmatprep.subr.bf16.mxu1 %v3081_v38  ;;  %v3105_v6 = vcombine.high %v423_v4, %v427_v63  ;;  %v3104_v12 = vcombine.low %v423_v4, %v427_v63  ;;  %v3135_v37 = vcombine.high %v454_v31, %v458_v32  ;;  %v479_v4 = vld [vmem:[#allocation4 + $0x2d8] sm:$0xff] }
 0x17b   :  { %v3137_v38 = vcombine.high %v455_v33, %v459_v34  ;;  %v483_v63 = vld [vmem:[#allocation4 + $0x2f8] sm:$0xff] }
 0x17c   :  { %2141 = vmatpush1.bf16.msra.mxu0 %v3078_v48  ;;  %v3134_v48 = vcombine.low %v454_v31, %v458_v32  ;;  %v503_v25 = vld [vmem:[#allocation4 + $0x398] sm:$0xff]  ;;  %v510_v31 = vld [vmem:[#allocation4 + $0x3d0] sm:$0xff] }
 0x17d   :  { %2227 = vmatpush1.bf16.msra.mxu1 %v3080_v49  ;;  %2142 = vmatprep.subr.bf16.mxu0 %v3087_v50  ;;  %v3136_v49 = vcombine.low %v455_v33, %v459_v34  ;;  %v3143_v50 = vcombine.high %v462_v39, %v466_v40  ;;  %v507_v26 = vld [vmem:[#allocation4 + $0x3b8] sm:$0xff]  ;;  %v514_v32 = vld [vmem:[#allocation4 + $0x3f0] sm:$0xff] }
 0x17e   :  { %2228 = vmatprep.subr.bf16.mxu1 %v3089_v51  ;;  %v3145_v51 = vcombine.high %v463_v42, %v467_v45  ;;  %v511_v33 = vld [vmem:[#allocation4 + $0x3d8] sm:$0xff] }
 0x17f   :  { %v515_v34 = vld [vmem:[#allocation4 + $0x3f8] sm:$0xff] }
 0x180   :  { %2143 = vmatpush1.bf16.msra.mxu0 %v3086_v56  ;;  %v3142_v56 = vcombine.low %v462_v39, %v466_v40  ;;  %v518_v39 = vld [vmem:[#allocation4 + $0x410] sm:$0xff] }
 0x181   :  { %2229 = vmatpush1.bf16.msra.mxu1 %v3088_v57  ;;  %2144 = vmatprep.subr.bf16.mxu0 %v3095_v58  ;;  %v3144_v57 = vcombine.low %v463_v42, %v467_v45  ;;  %v3151_v58 = vcombine.high %v470_v52, %v474_v53  ;;  %v522_v40 = vld [vmem:[#allocation4 + $0x430] sm:$0xff]  ;;  %v519_v42 = vld [vmem:[#allocation4 + $0x418] sm:$0xff] }
 0x182   :  { %2230 = vmatprep.subr.bf16.mxu1 %v3097_v59  ;;  %v3153_v59 = vcombine.high %v471_v54, %v475_v55  ;;  %v523_v45 = vld [vmem:[#allocation4 + $0x438] sm:$0xff] }
 0x184   :  { %2145 = vmatpush1.bf16.msra.mxu0 %v3094_v0  ;;  %v3150_v0 = vcombine.low %v470_v52, %v474_v53  ;;  %v526_v52 = vld [vmem:[#allocation4 + $0x450] sm:$0xff] }
 0x185   :  { %2231 = vmatpush1.bf16.msra.mxu1 %v3096_v1  ;;  %2146 = vmatprep.subr.bf16.mxu0 %v3103_v5  ;;  %v3152_v1 = vcombine.low %v471_v54, %v475_v55  ;;  %v3159_v5 = vcombine.high %v478_v61, %v482_v62  ;;  %v530_v53 = vld [vmem:[#allocation4 + $0x470] sm:$0xff]  ;;  %v3198_v54 = vcombine.low %v518_v39, %v522_v40  ;;  %v527_v55 = vld [vmem:[#allocation4 + $0x458] sm:$0xff] }
 0x186   :  { %2232 = vmatprep.subr.bf16.mxu1 %v3105_v6  ;;  %v3161_v6 = vcombine.high %v479_v4, %v483_v63 }
 0x188   :  { %2147 = vmatpush1.bf16.msra.mxu0 %v3102_v11  ;;  %v3158_v11 = vcombine.low %v478_v61, %v482_v62  ;;  %v538_v61 = vld [vmem:[#allocation4 + $0x4b0] sm:$0xff] }
 0x189   :  { %2233 = vmatpush1.bf16.msra.mxu1 %v3104_v12  ;;  %2148 = vmatprep.subr.bf16.mxu0 %v3111_v13  ;;  %v3160_v12 = vcombine.low %v479_v4, %v483_v63  ;;  %v3167_v13 = vcombine.high %v486_v7, %v490_v8  ;;  %v535_v4 = vld [vmem:[#allocation4 + $0x498] sm:$0xff] }
 0x18a   :  { %2234 = vmatprep.subr.bf16.mxu1 %v3113_v14  ;;  %v3169_v14 = vcombine.high %v487_v9, %v491_v10  ;;  %v539_v63 = vld [vmem:[#allocation4 + $0x4b8] sm:$0xff] }
 0x18c   :  { %2149 = vmatpush1.bf16.msra.mxu0 %v3110_v19  ;;  %v3166_v19 = vcombine.low %v486_v7, %v490_v8  ;;  %v542_v7 = vld [vmem:[#allocation4 + $0x4d0] sm:$0xff] }
 0x18d   :  { %2235 = vmatpush1.bf16.msra.mxu1 %v3112_v20  ;;  %2150 = vmatprep.subr.bf16.mxu0 %v3119_v21  ;;  %v3168_v20 = vcombine.low %v487_v9, %v491_v10  ;;  %v3175_v21 = vcombine.high %v494_v15, %v498_v16  ;;  %v546_v8 = vld [vmem:[#allocation4 + $0x4f0] sm:$0xff]  ;;  %v543_v9 = vld [vmem:[#allocation4 + $0x4d8] sm:$0xff] }
 0x18e   :  { %2236 = vmatprep.subr.bf16.mxu1 %v3121_v22  ;;  %v3177_v22 = vcombine.high %v495_v17, %v499_v18  ;;  %v547_v10 = vld [vmem:[#allocation4 + $0x4f8] sm:$0xff] }
 0x190   :  { %2151 = vmatpush1.bf16.msra.mxu0 %v3118_v27  ;;  %v3174_v27 = vcombine.low %v494_v15, %v498_v16  ;;  %v554_v15 = vld [vmem:[#allocation4 + $0x530] sm:$0xff]  ;;  %v551_v16 = vld [vmem:[#allocation4 + $0x518] sm:$0xff] }
 0x191   :  { %2237 = vmatpush1.bf16.msra.mxu1 %v3120_v28  ;;  %2152 = vmatprep.subr.bf16.mxu0 %v3127_v29  ;;  %v3176_v28 = vcombine.low %v495_v17, %v499_v18  ;;  %v3183_v29 = vcombine.high %v502_v23, %v506_v24  ;;  %v555_v17 = vld [vmem:[#allocation4 + $0x538] sm:$0xff]  ;;  %v3224_v18 = vcombine.low %v543_v9, %v547_v10 }
 0x192   :  { %2238 = vmatprep.subr.bf16.mxu1 %v3129_v30  ;;  %v3185_v30 = vcombine.high %v503_v25, %v507_v26 }
 0x194   :  { %2153 = vmatpush1.bf16.msra.mxu0 %v3126_v35  ;;  %v3182_v35 = vcombine.low %v502_v23, %v506_v24  ;;  %v559_v23 = vld [vmem:[#allocation4 + $0x558] sm:$0xff] }
 0x195   :  { %2239 = vmatpush1.bf16.msra.mxu1 %v3128_v36  ;;  %2154 = vmatprep.subr.bf16.mxu0 %v3135_v37  ;;  %v3184_v36 = vcombine.low %v503_v25, %v507_v26  ;;  %v3191_v37 = vcombine.high %v510_v31, %v514_v32  ;;  %v563_v24 = vld [vmem:[#allocation4 + $0x578] sm:$0xff]  ;;  %v3232_v26 = vcombine.low %v551_v16, %v555_v17 }
 0x196   :  { %2240 = vmatprep.subr.bf16.mxu1 %v3137_v38  ;;  %v3193_v38 = vcombine.high %v511_v33, %v515_v34 }
 0x198   :  { %2155 = vmatpush1.bf16.msra.mxu0 %v3134_v48  ;;  %v3190_v48 = vcombine.low %v510_v31, %v514_v32  ;;  %v567_v31 = vld [vmem:[#allocation4 + $0x598] sm:$0xff] }
 0x199   :  { %2241 = vmatpush1.bf16.msra.mxu1 %v3136_v49  ;;  %2156 = vmatprep.subr.bf16.mxu0 %v3143_v50  ;;  %v3192_v49 = vcombine.low %v511_v33, %v515_v34  ;;  %v3199_v50 = vcombine.high %v518_v39, %v522_v40  ;;  %v571_v32 = vld [vmem:[#allocation4 + $0x5b8] sm:$0xff]  ;;  %v3240_v34 = vcombine.low %v559_v23, %v563_v24 }
 0x19a   :  { %2242 = vmatprep.subr.bf16.mxu1 %v3145_v51  ;;  %v3201_v51 = vcombine.high %v519_v42, %v523_v45  ;;  %v575_v39 = vld [vmem:[#allocation4 + $0x5d8] sm:$0xff] }
 0x19b   :  { %v579_v40 = vld [vmem:[#allocation4 + $0x5f8] sm:$0xff] }
 0x19c   :  { %2157 = vmatpush1.bf16.msra.mxu0 %v3142_v56  ;;  %v531_v56 = vld [vmem:[#allocation4 + $0x478] sm:$0xff] }
 0x19d   :  { %2243 = vmatpush1.bf16.msra.mxu1 %v3144_v57  ;;  %2158 = vmatprep.subr.bf16.mxu0 %v3151_v58  ;;  %v3200_v57 = vcombine.low %v519_v42, %v523_v45  ;;  %v3207_v58 = vcombine.high %v526_v52, %v530_v53  ;;  %v3209_v62 = vcombine.high %v527_v55, %v531_v56 }
 0x19e   :  { %2244 = vmatprep.subr.bf16.mxu1 %v3153_v59  ;;  %v534_v59 = vld [vmem:[#allocation4 + $0x490] sm:$0xff]  ;;  %v3248_v45 = vcombine.low %v567_v31, %v571_v32 }
 0x1a0   :  { %2159 = vmatpush1.bf16.msra.mxu0 %v3150_v0  ;;  %v3206_v0 = vcombine.low %v526_v52, %v530_v53  ;;  %v583_v52 = vld [vmem:[#allocation4 + $0x618] sm:$0xff] }
 0x1a1   :  { %2245 = vmatpush1.bf16.msra.mxu1 %v3152_v1  ;;  %2160 = vmatprep.subr.bf16.mxu0 %v3159_v5  ;;  %v3208_v1 = vcombine.low %v527_v55, %v531_v56  ;;  %v3215_v5 = vcombine.high %v534_v59, %v538_v61  ;;  %v587_v53 = vld [vmem:[#allocation4 + $0x638] sm:$0xff]  ;;  %v3256_v55 = vcombine.low %v575_v39, %v579_v40 }
 0x1a2   :  { %2246 = vmatprep.subr.bf16.mxu1 %v3161_v6  ;;  %v3217_v6 = vcombine.high %v535_v4, %v539_v63 }
 0x1a4   :  { %2161 = vmatpush1.bf16.msra.mxu0 %v3158_v11  ;;  %v3214_v11 = vcombine.low %v534_v59, %v538_v61  ;;  %v594_v59 = vld [vmem:[#allocation4 + $0x670] sm:$0xff]  ;;  %v591_v61 = vld [vmem:[#allocation4 + $0x658] sm:$0xff] }
 0x1a5   :  { %2247 = vmatpush1.bf16.msra.mxu1 %v3160_v12  ;;  %2162 = vmatprep.subr.bf16.mxu0 %v3167_v13  ;;  %v3223_v12 = vcombine.high %v542_v7, %v546_v8  ;;  %v3225_v13 = vcombine.high %v543_v9, %v547_v10 }
 0x1a6   :  { %2248 = vmatprep.subr.bf16.mxu1 %v3169_v14  ;;  %v550_v14 = vld [vmem:[#allocation4 + $0x510] sm:$0xff] }
 0x1a7   :  { %v3230_v25 = vcombine.low %v550_v14, %v554_v15 }
 0x1a8   :  { %2163 = vmatpush1.bf16.msra.mxu0 %v3166_v19  ;;  %v3231_v19 = vcombine.high %v550_v14, %v554_v15  ;;  %v607_v14 = vld [vmem:[#allocation4 + $0x6d8] sm:$0xff] }
 0x1a9   :  { %2249 = vmatpush1.bf16.msra.mxu1 %v3168_v20  ;;  %2164 = vmatprep.subr.bf16.mxu0 %v3175_v21  ;;  %v3233_v20 = vcombine.high %v551_v16, %v555_v17  ;;  %v558_v21 = vld [vmem:[#allocation4 + $0x550] sm:$0xff]  ;;  %v611_v15 = vld [vmem:[#allocation4 + $0x6f8] sm:$0xff] }
 0x1aa   :  { %2250 = vmatprep.subr.bf16.mxu1 %v3177_v22  ;;  %v562_v22 = vld [vmem:[#allocation4 + $0x570] sm:$0xff] }
 0x1ab   :  { %v3238_v33 = vcombine.low %v558_v21, %v562_v22 }
 0x1ac   :  { %2165 = vmatpush1.bf16.msra.mxu0 %v3174_v27  ;;  %v3239_v27 = vcombine.high %v558_v21, %v562_v22  ;;  %v615_v21 = vld [vmem:[#allocation4 + $0x718] sm:$0xff] }
 0x1ad   :  { %2251 = vmatpush1.bf16.msra.mxu1 %v3176_v28  ;;  %2166 = vmatprep.subr.bf16.mxu0 %v3183_v29  ;;  %v3241_v28 = vcombine.high %v559_v23, %v563_v24  ;;  %v566_v29 = vld [vmem:[#allocation4 + $0x590] sm:$0xff]  ;;  %v619_v22 = vld [vmem:[#allocation4 + $0x738] sm:$0xff]  ;;  %v3288_v24 = vcombine.low %v607_v14, %v611_v15 }
 0x1ae   :  { %2252 = vmatprep.subr.bf16.mxu1 %v3185_v30  ;;  %v570_v30 = vld [vmem:[#allocation4 + $0x5b0] sm:$0xff] }
 0x1af   :  { %v3246_v42 = vcombine.low %v566_v29, %v570_v30 }
 0x1b0   :  { %2167 = vmatpush1.bf16.msra.mxu0 %v3182_v35  ;;  %v3247_v35 = vcombine.high %v566_v29, %v570_v30  ;;  %v623_v29 = vld [vmem:[#allocation4 + $0x758] sm:$0xff] }
 0x1b1   :  { %2253 = vmatpush1.bf16.msra.mxu1 %v3184_v36  ;;  %2168 = vmatprep.subr.bf16.mxu0 %v3191_v37  ;;  %v3249_v36 = vcombine.high %v567_v31, %v571_v32  ;;  %v574_v37 = vld [vmem:[#allocation4 + $0x5d0] sm:$0xff]  ;;  %v627_v30 = vld [vmem:[#allocation4 + $0x778] sm:$0xff]  ;;  %v3296_v32 = vcombine.low %v615_v21, %v619_v22 }
 0x1b2   :  { %2254 = vmatprep.subr.bf16.mxu1 %v3193_v38  ;;  %v578_v38 = vld [vmem:[#allocation4 + $0x5f0] sm:$0xff] }
 0x1b4   :  { %2169 = vmatpush1.bf16.msra.mxu0 %v3190_v48  ;;  %v3255_v48 = vcombine.high %v574_v37, %v578_v38 }
 0x1b5   :  { %2255 = vmatpush1.bf16.msra.mxu1 %v3192_v49  ;;  %2181 = vmatprep.subr.bf16.mxu0 %v3199_v50  ;;  %v3257_v49 = vcombine.high %v575_v39, %v579_v40  ;;  %v582_v50 = vld [vmem:[#allocation4 + $0x610] sm:$0xff]  ;;  %v3304_v40 = vcombine.low %v623_v29, %v627_v30 }
 0x1b6   :  { %2267 = vmatprep.subr.bf16.mxu1 %v3201_v51  ;;  %v586_v51 = vld [vmem:[#allocation4 + $0x630] sm:$0xff] }
 0x1b7   :  { %2171 = vmatmul.mubr.bf16.vlgmr.msra.gmra.mrb[8].mxu0 %v3811_v3  ;;  %v3263_v56 = vcombine.high %v582_v50, %v586_v51 }
 0x1b8   :  { %2257 = vmatmul.mubr.bf16.vlgmr.msra.gmra.mrb[8].mxu1 %v3811_v3  ;;  %2182 = vmatpush1.bf16.msra.mxu0 %v3198_v54  ;;  %v3216_v3 = vcombine.low %v535_v4, %v539_v63  ;;  %v3254_v54 = vcombine.low %v574_v37, %v578_v38  ;;  %v3262_v4 = vcombine.low %v582_v50, %v586_v51  ;;  %v631_v37 = vld [vmem:[#allocation4 + $0x798] sm:$0xff] }
 0x1b9   :  { %2213 = vmatprep.mubr.bf16.mxu0 %v3825_v47  ;;  %2268 = vmatpush1.bf16.msra.mxu1 %v3200_v57  ;;  %v3265_v57 = vcombine.high %v583_v52, %v587_v53  ;;  %v3264_v63 = vcombine.low %v583_v52, %v587_v53  ;;  %v635_v38 = vld [vmem:[#allocation4 + $0x7b8] sm:$0xff] }
 0x1ba   :  { %2299 = vmatprep.mubr.bf16.mxu1 %v3825_v47  ;;  %2183 = vmatprep.subr.bf16.mxu0 %v3207_v58  ;;  %v3222_v47 = vcombine.low %v542_v7, %v546_v8  ;;  %v590_v58 = vld [vmem:[#allocation4 + $0x650] sm:$0xff]  ;;  %v599_v7 = vld [vmem:[#allocation4 + $0x698] sm:$0xff]  ;;  %v3312_v53 = vcombine.low %v631_v37, %v635_v38 }
 0x1bb   :  { %2269 = vmatprep.subr.bf16.mxu1 %v3209_v62  ;;  %v595_v62 = vld [vmem:[#allocation4 + $0x678] sm:$0xff]  ;;  %v3270_v9 = vcombine.low %v590_v58, %v594_v59 }
 0x1bc   :  { %2184 = vmatpush1.bf16.msra.mxu0 %v3206_v0  ;;  %v3271_v0 = vcombine.high %v590_v58, %v594_v59  ;;  %v603_v8 = vld [vmem:[#allocation4 + $0x6b8] sm:$0xff]  ;;  %v3272_v10 = vcombine.low %v591_v61, %v595_v62  ;;  %v3575_v58 = vld [vmem:[#allocation6 + $0x40] sm:$0xff]  }
 0x1bd   :  { %2270 = vmatpush1.bf16.msra.mxu1 %v3208_v1  ;;  %2185 = vmatprep.subr.bf16.mxu0 %v3215_v5  ;;  %v3273_v1 = vcombine.high %v591_v61, %v595_v62  ;;  %v598_v5 = vld [vmem:[#allocation4 + $0x690] sm:$0xff]  ;;  %v3280_v17 = vcombine.low %v599_v7, %v603_v8  ;;  %v639_v50 = vld [vmem:[#allocation4 + $0x7d8] sm:$0xff]  ;;  %v3576_v59 = vld [vmem:[#allocation6 + $0xc0] sm:$0xff]  }
 0x1be   :  { %2271 = vmatprep.subr.bf16.mxu1 %v3217_v6  ;;  %v602_v6 = vld [vmem:[#allocation4 + $0x6b0] sm:$0xff]  ;;  %v643_v51 = vld [vmem:[#allocation4 + $0x7f8] sm:$0xff]  ;;  %v3577_v61 = vld [vmem:[#allocation6] sm:$0xff]  }
 0x1bf   :  { %v3278_v16 = vcombine.low %v598_v5, %v602_v6  ;;  %v3578_v62 = vld [vmem:[#allocation6 + $0x80] sm:$0xff]  }
 0x1c0   :  { %2186 = vmatpush1.bf16.msra.mxu0 %v3214_v11  ;;  %v3279_v11 = vcombine.high %v598_v5, %v602_v6  ;;  %v3583_v5 = vld [vmem:[#allocation6 + $0x50] sm:$0xff]  }
 0x1c1   :  { %2272 = vmatpush1.bf16.msra.mxu1 %v3216_v3  ;;  %2187 = vmatprep.subr.bf16.mxu0 %v3223_v12  ;;  %v3281_v3 = vcombine.high %v599_v7, %v603_v8  ;;  %v606_v12 = vld [vmem:[#allocation4 + $0x6d0] sm:$0xff] }
 0x1c2   :  { %2273 = vmatprep.subr.bf16.mxu1 %v3225_v13  ;;  %v610_v13 = vld [vmem:[#allocation4 + $0x6f0] sm:$0xff] }
 0x1c3   :  { %v3286_v23 = vcombine.low %v606_v12, %v610_v13  ;;  %v3584_v6 = vld [vmem:[#allocation6 + $0xd0] sm:$0xff]  }
 0x1c4   :  { %2188 = vmatpush1.bf16.msra.mxu0 %v3222_v47  ;;  %v3287_v47 = vcombine.high %v606_v12, %v610_v13  ;;  %v3585_v7 = vld [vmem:[#allocation6 + $0x10] sm:$0xff]   ;;  %v3592_v12 = vld [vmem:[#allocation6 + $0xe0] sm:$0xff]  }
 0x1c5   :  { %2274 = vmatpush1.bf16.msra.mxu1 %v3224_v18  ;;  %2189 = vmatprep.subr.bf16.mxu0 %v3231_v19  ;;  %v3289_v18 = vcombine.high %v607_v14, %v611_v15  ;;  %v614_v19 = vld [vmem:[#allocation4 + $0x710] sm:$0xff]  ;;  %v3593_v13 = vld [vmem:[#allocation6 + $0x20] sm:$0xff]   ;;  %v3595_v15 = vld [vmem:[#allocation6 + $0x68] sm:$0xff]  }
 0x1c6   :  { %2275 = vmatprep.subr.bf16.mxu1 %v3233_v20  ;;  %v618_v20 = vld [vmem:[#allocation4 + $0x730] sm:$0xff]  ;;  %v3594_v14 = vld [vmem:[#allocation6 + $0xa0] sm:$0xff]  }
 0x1c7   :  { %v3294_v31 = vcombine.low %v614_v19, %v618_v20  ;;  %v3586_v8 = vld [vmem:[#allocation6 + $0x90] sm:$0xff]  }
 0x1c8   :  { %2190 = vmatpush1.bf16.msra.mxu0 %v3230_v25  ;;  %v3295_v25 = vcombine.high %v614_v19, %v618_v20  ;;  %v3600_v19 = vld [vmem:[#allocation6 + $0xf0] sm:$0xff]  }
 0x1c9   :  { %2276 = vmatpush1.bf16.msra.mxu1 %v3232_v26  ;;  %2191 = vmatprep.subr.bf16.mxu0 %v3239_v27  ;;  %v3297_v26 = vcombine.high %v615_v21, %v619_v22  ;;  %v622_v27 = vld [vmem:[#allocation4 + $0x750] sm:$0xff]  ;;  %v3603_v22 = vld [vmem:[#allocation6 + $0x78] sm:$0xff]  }
 0x1ca   :  { %2277 = vmatprep.subr.bf16.mxu1 %v3241_v28  ;;  %v626_v28 = vld [vmem:[#allocation4 + $0x770] sm:$0xff] }
 0x1cb   :  { %v3302_v39 = vcombine.low %v622_v27, %v626_v28  ;;  %v3601_v20 = vld [vmem:[#allocation6 + $0x30] sm:$0xff]  }
 0x1cc   :  { %2192 = vmatpush1.bf16.msra.mxu0 %v3238_v33  ;;  %v3303_v33 = vcombine.high %v622_v27, %v626_v28  ;;  %v3602_v21 = vld [vmem:[#allocation6 + $0xb0] sm:$0xff]   ;;  %v3608_v27 = vld [vmem:[#allocation6 + $0x1c0] sm:$0xff]  }
 0x1cd   :  { %2278 = vmatpush1.bf16.msra.mxu1 %v3240_v34  ;;  %2193 = vmatprep.subr.bf16.mxu0 %v3247_v35  ;;  %v3305_v34 = vcombine.high %v623_v29, %v627_v30  ;;  %v630_v35 = vld [vmem:[#allocation4 + $0x790] sm:$0xff]  ;;  %v3842_v28 = vld [vmem:[%s3874_s4] sm:$0xff] }
 0x1ce   :  { %2279 = vmatprep.subr.bf16.mxu1 %v3249_v36  ;;  %v634_v36 = vld [vmem:[#allocation4 + $0x7b0] sm:$0xff]  ;;  %v649_v29 = vrot.slane %v3842_v28, %v106_v44  ;;  %v657_v30 = vrot.slane %v3842_v28, %v114_v60 }
 0x1cf   :  { %v3310_v52 = vcombine.low %v630_v35, %v634_v36 }
 0x1d0   :  { %2194 = vmatpush1.bf16.msra.mxu0 %v3246_v42  ;;  %v3311_v42 = vcombine.high %v630_v35, %v634_v36 }
 0x1d1   :  { %2280 = vmatpush1.bf16.msra.mxu1 %v3248_v45  ;;  %2195 = vmatprep.subr.bf16.mxu0 %v3255_v48  ;;  %v3313_v45 = vcombine.high %v631_v37, %v635_v38  ;;  %v638_v48 = vld [vmem:[#allocation4 + $0x7d0] sm:$0xff] }
 0x1d2   :  { %2281 = vmatprep.subr.bf16.mxu1 %v3257_v49  ;;  %v642_v49 = vld [vmem:[#allocation4 + $0x7f0] sm:$0xff] }
 0x1d4   :  { %2196 = vmatpush1.bf16.msra.mxu0 %v3254_v54  ;;  %v3319_v54 = vcombine.high %v638_v48, %v642_v49 }
 0x1d5   :  { %2282 = vmatpush1.bf16.msra.mxu1 %v3256_v55  ;;  %2197 = vmatprep.subr.bf16.mxu0 %v3263_v56  ;;  %v3321_v55 = vcombine.high %v639_v50, %v643_v51  ;;  %v3318_v56 = vcombine.low %v638_v48, %v642_v49 }
 0x1d6   :  { %2283 = vmatprep.subr.bf16.mxu1 %v3265_v57  ;;  %v3320_v57 = vcombine.low %v639_v50, %v643_v51 }
 0x1d8   :  { %2198 = vmatpush1.bf16.msra.mxu0 %v3262_v4  ;;  %v3579_v4 = vld [vmem:[#allocation6 + $0x48] sm:$0xff]  }
 0x1d9   :  { %2284 = vmatpush1.bf16.msra.mxu1 %v3264_v63  ;;  %2199 = vmatprep.subr.bf16.mxu0 %v3271_v0  ;;  %v3580_v63 = vld [vmem:[#allocation6 + $0xc8] sm:$0xff]  }
 0x1da   :  { %2285 = vmatprep.subr.bf16.mxu1 %v3273_v1  ;;  %v3581_v0 = vld [vmem:[#allocation6 + $0x8] sm:$0xff]  }
 0x1db   :  { %v3582_v1 = vld [vmem:[#allocation6 + $0x88] sm:$0xff]  }
 0x1dc   :  { %2200 = vmatpush1.bf16.msra.mxu0 %v3270_v9  ;;  %v3587_v9 = vld [vmem:[#allocation6 + $0x58] sm:$0xff]  }
 0x1dd   :  { %2286 = vmatpush1.bf16.msra.mxu1 %v3272_v10  ;;  %2201 = vmatprep.subr.bf16.mxu0 %v3279_v11  ;;  %v3588_v10 = vld [vmem:[#allocation6 + $0xd8] sm:$0xff]  }
 0x1de   :  { %2287 = vmatprep.subr.bf16.mxu1 %v3281_v3  ;;  %v3589_v11 = vld [vmem:[#allocation6 + $0x18] sm:$0xff]   ;;  %v3591_v3 = vld [vmem:[#allocation6 + $0x60] sm:$0xff]  }
 0x1e0   :  { %2202 = vmatpush1.bf16.msra.mxu0 %v3278_v16  ;;  %v3596_v16 = vld [vmem:[#allocation6 + $0xe8] sm:$0xff]  }
 0x1e1   :  { %2288 = vmatpush1.bf16.msra.mxu1 %v3280_v17  ;;  %2203 = vmatprep.subr.bf16.mxu0 %v3287_v47  ;;  %v3597_v17 = vld [vmem:[#allocation6 + $0x28] sm:$0xff]  }
 0x1e2   :  { %2289 = vmatprep.subr.bf16.mxu1 %v3289_v18  ;;  %v3598_v47 = vld [vmem:[#allocation6 + $0xa8] sm:$0xff]   ;;  %v3599_v18 = vld [vmem:[#allocation6 + $0x70] sm:$0xff]  }
 0x1e4   :  { %2204 = vmatpush1.bf16.msra.mxu0 %v3286_v23  ;;  %v3604_v23 = vld [vmem:[#allocation6 + $0xf8] sm:$0xff]  }
 0x1e5   :  { %2290 = vmatpush1.bf16.msra.mxu1 %v3288_v24  ;;  %2205 = vmatprep.subr.bf16.mxu0 %v3295_v25  ;;  %v3605_v24 = vld [vmem:[#allocation6 + $0x38] sm:$0xff]  }
 0x1e6   :  { %2291 = vmatprep.subr.bf16.mxu1 %v3297_v26  ;;  %v3606_v25 = vld [vmem:[#allocation6 + $0xb8] sm:$0xff]   ;;  %v3607_v26 = vld [vmem:[#allocation6 + $0x140] sm:$0xff]  }
 0x1e8   :  { %2206 = vmatpush1.bf16.msra.mxu0 %v3294_v31  ;;  %v653_v31 = vrot.slane %v3842_v28, %v110_v46 }
 0x1e9   :  { %2292 = vmatpush1.bf16.msra.mxu1 %v3296_v32  ;;  %2207 = vmatprep.subr.bf16.mxu0 %v3303_v33  ;;  %v661_v32 = vrot.slane %v3842_v28, %v118_v2 }
 0x1ea   :  { %2293 = vmatprep.subr.bf16.mxu1 %v3305_v34 }
 0x1ec   :  { %2208 = vmatpush1.bf16.msra.mxu0 %v3302_v39 }
 0x1ed   :  { %2294 = vmatpush1.bf16.msra.mxu1 %v3304_v40  ;;  %2209 = vmatprep.subr.bf16.mxu0 %v3311_v42 }
 0x1ee   :  { %2295 = vmatprep.subr.bf16.mxu1 %v3313_v45 }
 0x1f0   :  { %2210 = vmatpush1.bf16.msra.mxu0 %v3310_v52 }
 0x1f1   :  { %2296 = vmatpush1.bf16.msra.mxu1 %v3312_v53  ;;  %2211 = vmatprep.subr.bf16.mxu0 %v3319_v54 }
 0x1f2   :  { %2297 = vmatprep.subr.bf16.mxu1 %v3321_v55 }
 0x1f4   :  { %2212 = vmatpush1.bf16.msra.mxu0 %v3318_v56 }
 0x1f5   :  { %2298 = vmatpush1.bf16.msra.mxu1 %v3320_v57  ;;  %3396 = vmatprep.subr.bf16.mxu0 %v3575_v58 }
 0x1f6   :  { %3418 = vmatprep.subr.bf16.mxu1 %v3576_v59 }
 0x1f7   :  { %2214 = vmatmul.mubr.bf16.vlgmr.msra.gmra.mrb[8].mxu0 %v3823_v41 }
 0x1f8   :  { %2300 = vmatmul.mubr.bf16.vlgmr.msra.gmra.mrb[8].mxu1 %v3823_v41  ;;  %3397 = vmatpush3.bf16.msra.mxu0 %v3577_v61  ;;  %v3590_v41 = vld [vmem:[#allocation6 + $0x98] sm:$0xff]  }
 0x1f9   :  { %3419 = vmatpush3.bf16.msra.mxu1 %v3578_v62  ;;  %3398 = vmatprep.subr.bf16.mxu0 %v3579_v4  ;;  %v3609_v4 = vld [vmem:[#allocation6 + $0x100] sm:$0xff]  }
 0x1fa   :  { %3420 = vmatprep.subr.bf16.mxu1 %v3580_v63  ;;  %v3610_v63 = vld [vmem:[#allocation6 + $0x180] sm:$0xff]  }
 0x1fc   :  { %3399 = vmatpush3.bf16.msra.mxu0 %v3581_v0  ;;  %v3611_v0 = vld [vmem:[#allocation6 + $0x148] sm:$0xff]  }
 0x1fd   :  { %3421 = vmatpush3.bf16.msra.mxu1 %v3582_v1  ;;  %3400 = vmatprep.subr.bf16.mxu0 %v3583_v5  ;;  %v3612_v1 = vld [vmem:[#allocation6 + $0x1c8] sm:$0xff]  }
 0x1fe   :  { %3422 = vmatprep.subr.bf16.mxu1 %v3584_v6  ;;  %v3613_v5 = vld [vmem:[#allocation6 + $0x108] sm:$0xff]  }
 0x1ff   :  { %v3614_v6 = vld [vmem:[#allocation6 + $0x188] sm:$0xff]  }
 0x200   :  { %3401 = vmatpush3.bf16.msra.mxu0 %v3585_v7  ;;  %v3615_v7 = vld [vmem:[#allocation6 + $0x150] sm:$0xff]  }
 0x201   :  { %3423 = vmatpush3.bf16.msra.mxu1 %v3586_v8  ;;  %3402 = vmatprep.subr.bf16.mxu0 %v3587_v9  ;;  %v3616_v8 = vld [vmem:[#allocation6 + $0x1d0] sm:$0xff]  }
 0x202   :  { %3424 = vmatprep.subr.bf16.mxu1 %v3588_v10  ;;  %v3617_v9 = vld [vmem:[#allocation6 + $0x110] sm:$0xff]  }
 0x203   :  { %v3618_v10 = vld [vmem:[#allocation6 + $0x190] sm:$0xff]  }
 0x204   :  { %3403 = vmatpush3.bf16.msra.mxu0 %v3589_v11  ;;  %v3619_v11 = vld [vmem:[#allocation6 + $0x158] sm:$0xff]  }
 0x205   :  { %3425 = vmatpush3.bf16.msra.mxu1 %v3590_v41  ;;  %3404 = vmatprep.subr.bf16.mxu0 %v3591_v3  ;;  %v3620_v41 = vld [vmem:[#allocation6 + $0x1d8] sm:$0xff]  }
 0x206   :  { %3426 = vmatprep.subr.bf16.mxu1 %v3592_v12  ;;  %v3621_v3 = vld [vmem:[#allocation6 + $0x118] sm:$0xff]  }
 0x207   :  { %v3622_v12 = vld [vmem:[#allocation6 + $0x198] sm:$0xff]  }
 0x208   :  { %3405 = vmatpush3.bf16.msra.mxu0 %v3593_v13  ;;  %v3623_v13 = vld [vmem:[#allocation6 + $0x160] sm:$0xff]  }
 0x209   :  { %3427 = vmatpush3.bf16.msra.mxu1 %v3594_v14  ;;  %3406 = vmatprep.subr.bf16.mxu0 %v3595_v15  ;;  %v3624_v14 = vld [vmem:[#allocation6 + $0x1e0] sm:$0xff]  }
 0x20a   :  { %3428 = vmatprep.subr.bf16.mxu1 %v3596_v16  ;;  %v3625_v15 = vld [vmem:[#allocation6 + $0x120] sm:$0xff]  }
 0x20b   :  { %v3626_v16 = vld [vmem:[#allocation6 + $0x1a0] sm:$0xff]  }
 0x20c   :  { %3407 = vmatpush3.bf16.msra.mxu0 %v3597_v17  ;;  %v3627_v17 = vld [vmem:[#allocation6 + $0x168] sm:$0xff]  }
 0x20d   :  { %3429 = vmatpush3.bf16.msra.mxu1 %v3598_v47  ;;  %3408 = vmatprep.subr.bf16.mxu0 %v3599_v18  ;;  %v3628_v47 = vld [vmem:[#allocation6 + $0x1e8] sm:$0xff]  }
 0x20e   :  { %3430 = vmatprep.subr.bf16.mxu1 %v3600_v19  ;;  %v3629_v18 = vld [vmem:[#allocation6 + $0x128] sm:$0xff]  }
 0x20f   :  { %v3630_v19 = vld [vmem:[#allocation6 + $0x1a8] sm:$0xff]  }
 0x210   :  { %3409 = vmatpush3.bf16.msra.mxu0 %v3601_v20  ;;  %v3631_v20 = vld [vmem:[#allocation6 + $0x170] sm:$0xff]  }
 0x211   :  { %3431 = vmatpush3.bf16.msra.mxu1 %v3602_v21  ;;  %3410 = vmatprep.subr.bf16.mxu0 %v3603_v22  ;;  %v3632_v21 = vld [vmem:[#allocation6 + $0x1f0] sm:$0xff]  }
 0x212   :  { %3432 = vmatprep.subr.bf16.mxu1 %v3604_v23  ;;  %v3633_v22 = vld [vmem:[#allocation6 + $0x130] sm:$0xff]  }
 0x213   :  { %v3634_v23 = vld [vmem:[#allocation6 + $0x1b0] sm:$0xff]  }
 0x214   :  { %3411 = vmatpush3.bf16.msra.mxu0 %v3605_v24  ;;  %v3635_v24 = vld [vmem:[#allocation6 + $0x178] sm:$0xff]  }
 0x215   :  { %3433 = vmatpush3.bf16.msra.mxu1 %v3606_v25  ;;  %3440 = vmatprep.subr.bf16.mxu0 %v3607_v26  ;;  %v3636_v25 = vld [vmem:[#allocation6 + $0x1f8] sm:$0xff]  }
 0x216   :  { %3462 = vmatprep.subr.bf16.mxu1 %v3608_v27  ;;  %v3637_v26 = vld [vmem:[#allocation6 + $0x138] sm:$0xff]  }
 0x217   :  { %v3638_v27 = vld [vmem:[#allocation6 + $0x1b8] sm:$0xff]  }
 0x24a   :  { %v2043_v33 = vpop.f32.mrb[4].mxu0  ;;  %v2129_v34 = vpop.f32.mrb[4].mxu1 }
 0x24b   :  { %v3484_v35 = vadd.f32 %v2043_v33, %v649_v29  ;;  %v3488_v36 = vadd.f32 %v2129_v34, %v657_v30  ;;  %v2045_v37 = vpop.f32.mrb[5].mxu0  ;;  %v2131_v38 = vpop.f32.mrb[5].mxu1 }
 0x24c   :  { %v3485_v39 = vadd.f32 %v2045_v37, %v653_v31  ;;  %v3489_v44 = vadd.f32 %v2131_v38, %v661_v32  ;;  %v2047_v40 = vpop.f32.mrb[6].mxu0  ;;  %v2133_v42 = vpop.f32.mrb[6].mxu1 }
 0x24d   :  { %v3486_v45 = vadd.f32 %v2047_v40, %v649_v29  ;;  %v3490_v60 = vadd.f32 %v2133_v42, %v657_v30  ;;  %v2049_v48 = vpop.f32.mrb[7].mxu0  ;;  %v2135_v49 = vpop.f32.mrb[7].mxu1  ;;  %v2310_v51 = vmax.f32 %v3484_v35, 0.0  ;;  %v2312_v52 = vmax.f32 %v3488_v36, 0.0 }
 0x24e   :  { %v3487_v50 = vadd.f32 %v2049_v48, %v653_v31  ;;  %v3491_v46 = vadd.f32 %v2135_v49, %v661_v32  ;;  %v2311_v54 = vmax.f32 %v3485_v39, 0.0  ;;  %v2313_v55 = vmax.f32 %v3489_v44, 0.0 }
 0x24f   :  { %v2318_v53 = vmax.f32 %v3486_v45, 0.0  ;;  %v2320_v2 = vmax.f32 %v3490_v60, 0.0  ;;  %v664_v29 = vsub.s32 4, %v3798_v43  ;;  %v672_v30 = vsub.s32 6, %v3798_v43 }
 0x250   :  { %v2319_v56 = vmax.f32 %v3487_v50, 0.0  ;;  %v2321_v57 = vmax.f32 %v3491_v46, 0.0  ;;  %v668_v31 = vsub.s32 5, %v3798_v43  ;;  %v676_v32 = vsub.s32 7, %v3798_v43 }
 0x251   :  { %v2326_v58 = vpack.c.bf16 %v2318_v53, %v2310_v51  ;;  %v2328_v59 = vpack.c.bf16 %v2320_v2, %v2312_v52  ;;  %v665_v33 = vrot.slane %v3842_v28, %v664_v29  ;;  %v673_v34 = vrot.slane %v3842_v28, %v672_v30 }
 0x252   :  { %v2327_v61 = vpack.c.bf16 %v2319_v56, %v2311_v54  ;;  %v2329_v62 = vpack.c.bf16 %v2321_v57, %v2313_v55  ;;  %v669_v35 = vrot.slane %v3842_v28, %v668_v31  ;;  %v677_v36 = vrot.slane %v3842_v28, %v676_v32 }
 0x254   :  { %2885 = vmatprep.mubr.bf16.mxu0 %v2327_v61  ;;  %2926 = vmatprep.mubr.bf16.mxu1 %v2329_v62 }
 0x255   :  { %2886 = vmatmul.mubr.bf16.vlgmr.msra.gmra.mrb[12].mxu0 %v2326_v58  ;;  %2927 = vmatmul.mubr.bf16.vlgmr.msra.gmra.mrb[12].mxu1 %v2328_v59 }
 0x256   :  { %3441 = vmatpush3.bf16.msra.mxu0 %v3609_v4  ;;  %3463 = vmatpush3.bf16.msra.mxu1 %v3610_v63 }
 0x257   :  { %3442 = vmatprep.subr.bf16.mxu0 %v3611_v0  ;;  %3464 = vmatprep.subr.bf16.mxu1 %v3612_v1 }
 0x25a   :  { %3443 = vmatpush3.bf16.msra.mxu0 %v3613_v5  ;;  %3465 = vmatpush3.bf16.msra.mxu1 %v3614_v6  ;;  %v3322_v5 = vld [vmem:[%s3876_s6] ss:$0 sm:$0xff] }
 0x25b   :  { %3444 = vmatprep.subr.bf16.mxu0 %v3615_v7  ;;  %3466 = vmatprep.subr.bf16.mxu1 %v3616_v8 }
 0x25e   :  { %3445 = vmatpush3.bf16.msra.mxu0 %v3617_v9  ;;  %3467 = vmatpush3.bf16.msra.mxu1 %v3618_v10 }
 0x25f   :  { %3446 = vmatprep.subr.bf16.mxu0 %v3619_v11  ;;  %3468 = vmatprep.subr.bf16.mxu1 %v3620_v41 }
 0x262   :  { %3447 = vmatpush3.bf16.msra.mxu0 %v3621_v3  ;;  %3469 = vmatpush3.bf16.msra.mxu1 %v3622_v12 }
 0x263   :  { %3448 = vmatprep.subr.bf16.mxu0 %v3623_v13  ;;  %3470 = vmatprep.subr.bf16.mxu1 %v3624_v14 }
 0x266   :  { %3449 = vmatpush3.bf16.msra.mxu0 %v3625_v15  ;;  %3471 = vmatpush3.bf16.msra.mxu1 %v3626_v16 }
 0x267   :  { %3450 = vmatprep.subr.bf16.mxu0 %v3627_v17  ;;  %3472 = vmatprep.subr.bf16.mxu1 %v3628_v47 }
 0x26a   :  { %3451 = vmatpush3.bf16.msra.mxu0 %v3629_v18  ;;  %3473 = vmatpush3.bf16.msra.mxu1 %v3630_v19 }
 0x26b   :  { %3452 = vmatprep.subr.bf16.mxu0 %v3631_v20  ;;  %3474 = vmatprep.subr.bf16.mxu1 %v3632_v21 }
 0x26e   :  { %3453 = vmatpush3.bf16.msra.mxu0 %v3633_v22  ;;  %3475 = vmatpush3.bf16.msra.mxu1 %v3634_v23 }
 0x26f   :  { %3454 = vmatprep.subr.bf16.mxu0 %v3635_v24  ;;  %3476 = vmatprep.subr.bf16.mxu1 %v3636_v25 }
 0x272   :  { %3455 = vmatpush3.bf16.msra.mxu0 %v3637_v26  ;;  %3477 = vmatpush3.bf16.msra.mxu1 %v3638_v27 }
 0x2ca   :  { %v2215_v37 = vpop.f32.mrb[8].mxu0 }
 0x2cb   :  { %v3492_v38 = vadd.f32 %v2215_v37, %v665_v33  ;;  %v2301_v39 = vpop.f32.mrb[8].mxu1  ;;  %v2217_v44 = vpop.f32.mrb[9].mxu0 }
 0x2cc   :  { %v3496_v40 = vadd.f32 %v2301_v39, %v673_v34  ;;  %v3493_v42 = vadd.f32 %v2217_v44, %v669_v35  ;;  %v2303_v45 = vpop.f32.mrb[9].mxu1  ;;  %v2219_v60 = vpop.f32.mrb[10].mxu0 }
 0x2cd   :  { %v3497_v48 = vadd.f32 %v2303_v45, %v677_v36  ;;  %v3494_v49 = vadd.f32 %v2219_v60, %v665_v33  ;;  %v2305_v50 = vpop.f32.mrb[10].mxu1  ;;  %v2221_v43 = vpop.f32.mrb[11].mxu0  ;;  %v2314_v53 = vmax.f32 %v3492_v38, 0.0 }
 0x2ce   :  { %v3498_v46 = vadd.f32 %v2305_v50, %v673_v34  ;;  %v3495_v51 = vadd.f32 %v2221_v43, %v669_v35  ;;  %v2307_v52 = vpop.f32.mrb[11].mxu1  ;;  %v2316_v55 = vmax.f32 %v3496_v40, 0.0  ;;  %v2315_v28 = vmax.f32 %v3493_v42, 0.0 }
 0x2cf   :  { %v2322_v2 = vmax.f32 %v3494_v49, 0.0  ;;  %v3499_v54 = vadd.f32 %v2307_v52, %v677_v36  ;;  %v2317_v58 = vmax.f32 %v3497_v48, 0.0 }
 0x2d0   :  { %v2324_v56 = vmax.f32 %v3498_v46, 0.0  ;;  %v2323_v57 = vmax.f32 %v3495_v51, 0.0 }
 0x2d1   :  { %v2330_v59 = vpack.c.bf16 %v2322_v2, %v2314_v53  ;;  %v2325_v61 = vmax.f32 %v3499_v54, 0.0 }
 0x2d2   :  { %v2332_v62 = vpack.c.bf16 %v2324_v56, %v2316_v55  ;;  %v2331_v4 = vpack.c.bf16 %v2323_v57, %v2315_v28 }
 0x2d3   :  { %v2333_v63 = vpack.c.bf16 %v2325_v61, %v2317_v58 }
 0x2d4   :  { %2967 = vmatprep.mubr.bf16.mxu0 %v2331_v4 }
 0x2d5   :  { %3008 = vmatprep.mubr.bf16.mxu1 %v2333_v63  ;;  %2968 = vmatmul.mubr.bf16.vlgmr.msra.gmra.mrb[16].mxu0 %v2330_v59 }
 0x2d6   :  { %3009 = vmatmul.mubr.bf16.vlgmr.msra.gmra.mrb[16].mxu1 %v2332_v62 }
 0x328   :  { %v3412_v0 = vpop.f32.mrb[12].mxu0  ;;  %v3434_v1 = vpop.f32.mrb[12].mxu1 }
 0x329   :  { %v3413_v6 = vpop.f32.mrb[13].mxu0  ;;  %v3435_v7 = vpop.f32.mrb[13].mxu1 }
 0x32a   :  { %v3414_v8 = vadd.f32 %v3413_v6, %v3412_v0  ;;  %v3436_v9 = vadd.f32 %v3435_v7, %v3434_v1  ;;  %v3415_v10 = vpop.f32.mrb[14].mxu0  ;;  %v3437_v11 = vpop.f32.mrb[14].mxu1 }
 0x32b   :  { %v3416_v41 = vpop.f32.mrb[15].mxu0  ;;  %v3438_v3 = vpop.f32.mrb[15].mxu1 }
 0x32c   :  { %v2888_v12 = vadd.f32 %v3414_v8, %v3322_v5  ;;  %v3417_v13 = vadd.f32 %v3416_v41, %v3415_v10  ;;  %v3439_v14 = vadd.f32 %v3438_v3, %v3437_v11 }
 0x32e   :  { %v2929_v15 = vadd.f32 %v3436_v9, %v2888_v12  ;;  %v2891_v16 = vadd.f32 %v3417_v13, %v3322_v5 }
 0x330   :  { %v2932_v17 = vadd.f32 %v3439_v14, %v2891_v16 }
 0x3a8   :  { %v3456_v47 = vpop.f32.mrb[16].mxu0 }
 0x3a9   :  { %v3478_v18 = vpop.f32.mrb[16].mxu1  ;;  %v3457_v19 = vpop.f32.mrb[17].mxu0 }
 0x3aa   :  { %v3458_v20 = vadd.f32 %v3457_v19, %v3456_v47  ;;  %v3479_v21 = vpop.f32.mrb[17].mxu1  ;;  %v3459_v22 = vpop.f32.mrb[18].mxu0 }
 0x3ab   :  { %v3480_v23 = vadd.f32 %v3479_v21, %v3478_v18  ;;  %v3481_v24 = vpop.f32.mrb[18].mxu1  ;;  %v3460_v25 = vpop.f32.mrb[19].mxu0 }
 0x3ac   :  { %v2970_v26 = vadd.f32 %v3458_v20, %v2929_v15  ;;  %v3461_v27 = vadd.f32 %v3460_v25, %v3459_v22  ;;  %v3482_v29 = vpop.f32.mrb[19].mxu1 }
 0x3ad   :  { %v3483_v30 = vadd.f32 %v3482_v29, %v3481_v24 }
 0x3ae   :  { %v3011_v31 = vadd.f32 %v3480_v23, %v2970_v26  ;;  %v2973_v32 = vadd.f32 %v3461_v27, %v2932_v17 }
 0x3b0   :  { %v3014_v33 = vadd.f32 %v3483_v30, %v2973_v32 }
 0x3b2   :  { %v3394_v34 = vpack.c.bf16 %v3014_v33, %v3011_v31 }
 0x3b4   :  { %3395 = vst [vmem:[%s3877_s7] sm:$0xff] %v3394_v34  }
 0x3b5   :  { %3031 = vsyncpa [#allocation3], 1 }
 0x3b6   :  { %3032 = vsyncpa [#allocation5], 1 }

</bundles_post_ra>
